<compile_context>
chip_gen: v7x
topology: tpu7x:2x2x1
jax: 0.10.0
libtpu: 0.0.40
codegen_flags: <defaults>
</compile_context>

<pallas_src>
import functools
import numpy as np
import jax
import jax.numpy as jnp
from jax.experimental import pallas as pl
from jax.experimental.pallas import tpu as pltpu


# ----------------------------- hyper-params ---------------------------------
B = 2          # batch
N = 8          # channels of the feature map (== token dim)
H = W = 8      # spatial size of the input feature map
HEADS = 2
DIM_HEAD = 16
DEPTH = 2
INNER = HEADS * DIM_HEAD          # 32
SCALE = DIM_HEAD ** (-0.5)
KS, STRIDE, PAD = 3, 2, 1
HO, WO = H // 2, W // 2           # stride-2, pad-1, k-3 conv output spatial


# ------------------------------ fused kernel --------------------------------
def _fused_forward_kernel(cols_ref, xt_ref, wcol_ref, bconv_ref,
                          wq_ref, wk_ref, wv_ref, wo_ref, bo_ref,
                          o_ref, *, depth, heads):
    """Whole Convtransformer forward for one batch element, VMEM resident."""
    cols = cols_ref[0]          # (n_ds, C*KS*KS)  im2col patches of this batch element
    xt = xt_ref[0]              # (n_full, C)      full-resolution tokens of this batch

    # ---- conv (stride-2 downsampling) as im2col GEMM + bias ----
    ds = jnp.dot(cols, wcol_ref[...], preferred_element_type=jnp.float32) + bconv_ref[...]
    identity = ds               # (n_ds, C)

    # ---- attention stack (residual inside each layer) ----
    for d in range(depth):
        attn_out = bo_ref[d]    # (1, C) output-projection bias, broadcasts over tokens
        for h in range(heads):
            idx = d * heads + h
            # projections: weights are pre-transposed / per-head / scale folded into wq
            q = jnp.dot(ds, wq_ref[idx], preferred_element_type=jnp.float32)   # (n_ds, dh)
            k = jnp.dot(xt, wk_ref[idx], preferred_element_type=jnp.float32)   # (n_full, dh)
            v = jnp.dot(xt, wv_ref[idx], preferred_element_type=jnp.float32)   # (n_full, dh)
            # q @ k^T without materializing a transposed copy of k
            dots = jax.lax.dot_general(q, k, (((1,), (1,)), ((), ())),
                                       preferred_element_type=jnp.float32)     # (n_ds, n_full)
            dots = dots - jnp.max(dots, axis=-1, keepdims=True)
            e = jnp.exp(dots)
            attn = e * pl.reciprocal(jnp.sum(e, axis=-1, keepdims=True), approx=True)
            out_h = jnp.dot(attn, v, preferred_element_type=jnp.float32)        # (n_ds, dh)
            # summing per-head partial output projections == concat(heads) @ Wo^T
            attn_out = attn_out + jnp.dot(out_h, wo_ref[idx],
                                          preferred_element_type=jnp.float32)   # (n_ds, C)
        ds = attn_out + ds       # attn(downsample_x, x) + downsample_x

    o_ref[0] = ds + identity     # depth > 0 branch of the PyTorch module


def fused_forward(cols, x_tokens, p):
    """cols: (B, n_ds, C*k*k), x_tokens: (B, n_full, C) -> tokens (B, n_ds, C)."""
    b, n_ds, ck2 = cols.shape
    n_full, c = x_tokens.shape[1], x_tokens.shape[2]
    kern = functools.partial(_fused_forward_kernel, depth=DEPTH, heads=HEADS)
    return pl.pallas_call(
        kern,
        out_shape=jax.ShapeDtypeStruct((b, n_ds, c), jnp.float32),
        grid_spec=pltpu.PrefetchScalarGridSpec(
            num_scalar_prefetch=0,
            grid=(b,),
            in_specs=[
                pl.BlockSpec((1, n_ds, ck2), lambda i: (i, 0, 0)),                # im2col cols
                pl.BlockSpec((1, n_full, c), lambda i: (i, 0, 0)),                # full-res tokens
                pl.BlockSpec((ck2, c), lambda i: (0, 0)),                         # conv weight^T
                pl.BlockSpec((1, c), lambda i: (0, 0)),                           # conv bias
                pl.BlockSpec((DEPTH * HEADS, c, DIM_HEAD), lambda i: (0, 0, 0)),  # Wq^T (scaled)
                pl.BlockSpec((DEPTH * HEADS, c, DIM_HEAD), lambda i: (0, 0, 0)),  # Wk^T
                pl.BlockSpec((DEPTH * HEADS, c, DIM_HEAD), lambda i: (0, 0, 0)),  # Wv^T
                pl.BlockSpec((DEPTH * HEADS, DIM_HEAD, c), lambda i: (0, 0, 0)),  # Wo^T
                pl.BlockSpec((DEPTH, 1, c), lambda i: (0, 0, 0)),                 # out bias
            ],
            out_specs=pl.BlockSpec((1, n_ds, c), lambda i: (i, 0, 0)),
        ),
        compiler_params=pltpu.CompilerParams(dimension_semantics=("parallel",)),
    )(cols, x_tokens, p["w_col_t"], p["conv_b2d"],
      p["wqT"], p["wkT"], p["wvT"], p["woT"], p["bo2d"])


# ------------------------------ glue (plain JAX) ----------------------------
def im2col(x, k=KS, stride=STRIDE, pad=PAD):
    """x: (B, C, H, W) -> cols (B, Ho*Wo, C*k*k), channel-major then kernel-pos,
    matching PyTorch conv weight.reshape(Cout, Cin*kh*kw)."""
    b, c, h, w = x.shape
    xp = jnp.pad(x, ((0, 0), (0, 0), (pad, pad), (pad, pad)))
    ho = (h + 2 * pad - k) // stride + 1
    wo = (w + 2 * pad - k) // stride + 1
    patches = [xp[:, :, i:i + stride * ho:stride, j:j + stride * wo:stride]
               for i in range(k) for j in range(k)]
    p = jnp.stack(patches, axis=2)                     # (B, C, k*k, Ho, Wo)
    cols = p.reshape(b, c * k * k, ho * wo)
    return jnp.transpose(cols, (0, 2, 1)), ho, wo      # (B, Ho*Wo, C*k*k)


def init_params(key):
    """Raw parameters in PyTorch layout."""
    keys = jax.random.split(key, 2 + 4 * DEPTH)
    params = {
        "conv_w": 0.1 * jax.random.normal(keys[0], (N, N, KS, KS), jnp.float32),
        "conv_b": 0.1 * jax.random.normal(keys[1], (N,), jnp.float32),
        "layers": [],
    }
    for d in range(DEPTH):
        kq, kkv, kwo, kbo = keys[2 + 4 * d: 6 + 4 * d]
        params["layers"].append({
            "wq": 0.1 * jax.random.normal(kq, (INNER, N), jnp.float32),      # Linear(N, inner)
            "wkv": 0.1 * jax.random.normal(kkv, (2 * INNER, N), jnp.float32),
            "wo": 0.1 * jax.random.normal(kwo, (N, INNER), jnp.float32),     # Linear(inner, N)
            "bo": 0.1 * jax.random.normal(kbo, (N,), jnp.float32),
        })
    return params


def prepare_params(raw):
    """One-time layout transforms: transpose, split per head, fold the 1/sqrt(d) scale."""
    wq_l, wk_l, wv_l, wo_l, bo_l = [], [], [], [], []
    for lp in raw["layers"]:
        # to_q weight (inner, N) -> per-head, transposed (heads, N, dh), scale folded in.
        wq_l.append(jnp.transpose(lp["wq"].reshape(HEADS, DIM_HEAD, N), (0, 2, 1)) * SCALE)
        wk, wv = lp["wkv"][:INNER], lp["wkv"][INNER:]          # chunk(2, dim=-1) of kv
        wk_l.append(jnp.transpose(wk.reshape(HEADS, DIM_HEAD, N), (0, 2, 1)))
        wv_l.append(jnp.transpose(wv.reshape(HEADS, DIM_HEAD, N), (0, 2, 1)))
        # to_out weight (N, inner) -> transposed and split per head (heads, dh, N).
        wo_l.append(lp["wo"].T.reshape(HEADS, DIM_HEAD, N))
        bo_l.append(lp["bo"].reshape(1, N))
    return {
        "w_col_t": raw["conv_w"].reshape(N, N * KS * KS).T,    # (C*k*k, N)
        "conv_b2d": raw["conv_b"].reshape(1, N),
        "wqT": jnp.concatenate(wq_l, axis=0),                  # (DEPTH*HEADS, N, dh)
        "wkT": jnp.concatenate(wk_l, axis=0),
        "wvT": jnp.concatenate(wv_l, axis=0),
        "woT": jnp.concatenate(wo_l, axis=0),                  # (DEPTH*HEADS, dh, N)
        "bo2d": jnp.stack(bo_l, axis=0),                       # (DEPTH, 1, N)
    }


@jax.jit
def convtransformer_forward(prepped, x):
    """x: (B, N, H, W) NCHW -> (B, N, H//2, W//2) NCHW."""
    b = x.shape[0]
    # TODO(synk): the stride-2 im2col gather stays as jit-fused XLA glue feeding the single
    # kernel; doing it in-kernel needs strided loads whose lowering is not guaranteed here.
    cols, ho, wo = im2col(x)                                         # (B, Ho*Wo, C*9)
    x_tokens = jnp.transpose(x, (0, 2, 3, 1)).reshape(b, H * W, N)   # 'b c h w -> b (h w) c'
    out_tokens = fused_forward(cols, x_tokens, prepped)              # (B, Ho*Wo, N)
    out = out_tokens.reshape(b, ho, wo, N)                           # 'b (h w) c -> b c h w'
    return jnp.transpose(out, (0, 3, 1, 2))


# ------------------------- pure-JAX reference (check) -----------------------
def reference_forward(params, x):
    cols, ho, wo = im2col(x)
    conv_out = cols @ params["conv_w"].reshape(N, -1).T + params["conv_b"]
    ds = conv_out.reshape(x.shape[0], ho * wo, N)
    identity = ds
    xt = jnp.transpose(x, (0, 2, 3, 1)).reshape(x.shape[0], H * W, N)
    for lp in params["layers"]:
        q = ds @ lp["wq"].T
        kv = xt @ lp["wkv"].T
        k, v = kv[..., :INNER], kv[..., INNER:]

        def split_heads(t):
            b, n, _ = t.shape
            return jnp.transpose(t.reshape(b, n, HEADS, DIM_HEAD), (0, 2, 1, 3))

        qh, kh, vh = split_heads(q), split_heads(k), split_heads(v)
        dots = jnp.einsum("bhnd,bhmd->bhnm", qh, kh) * SCALE
        attn = jax.nn.softmax(dots, axis=-1)
        oh = jnp.einsum("bhnm,bhmd->bhnd", attn, vh)
        o = jnp.transpose(oh, (0, 2, 1, 3)).reshape(x.shape[0], -1, INNER)
        ds = (o @ lp["wo"].T + lp["bo"]) + ds
    out = (ds + identity).reshape(x.shape[0], ho, wo, N)
    return jnp.transpose(out, (0, 3, 1, 2))


# ------------------------------------ main -----------------------------------
if __name__ == "__main__":
    key = jax.random.PRNGKey(0)
    kx, kp = jax.random.split(key)
    x = jax.random.normal(kx, (B, N, H, W), jnp.float32)       # NCHW, like PyTorch
    raw_params = init_params(kp)
    prepped = prepare_params(raw_params)

    out = convtransformer_forward(prepped, x)
    out = jax.block_until_ready(out)

    ref = jax.block_until_ready(reference_forward(raw_params, x))
    assert out.shape == (B, N, H // 2, W // 2), out.shape
    # slightly loose tolerance: softmax denominator uses the EUP approximate reciprocal
    np.testing.assert_allclose(np.asarray(out), np.asarray(ref), rtol=2e-3, atol=2e-3)

    print("KERNEL_OK")
</pallas_src>

<mosaic_0001>
module attributes {stable_mosaic.version = 11 : i64} {
  func.func @_fused_forward_kernel(%arg0: i32, %arg1: memref<1x16x72xf32, #tpu.memory_space<vmem>>, %arg2: memref<1x64x8xf32, #tpu.memory_space<vmem>>, %arg3: memref<72x8xf32, #tpu.memory_space<vmem>>, %arg4: memref<1x8xf32, #tpu.memory_space<vmem>>, %arg5: memref<4x8x16xf32, #tpu.memory_space<vmem>>, %arg6: memref<4x8x16xf32, #tpu.memory_space<vmem>>, %arg7: memref<4x8x16xf32, #tpu.memory_space<vmem>>, %arg8: memref<4x16x8xf32, #tpu.memory_space<vmem>>, %arg9: memref<2x1x8xf32, #tpu.memory_space<vmem>>, %arg10: memref<1x16x8xf32, #tpu.memory_space<vmem>>) attributes {dimension_semantics = [#tpu.dimension_semantics<parallel>], iteration_bounds = array<i64: 2>, scalar_prefetch = 0 : i64, scratch_operands = 0 : i64, tpu.core_type = #tpu.core_type<tc>, window_params = [{transform_indices = @transform_0, window_bounds = array<i64: 1, 16, 72>}, {transform_indices = @transform_1, window_bounds = array<i64: 1, 64, 8>}, {pipeline_mode = #tpu.pipeline_mode<synchronous>, transform_indices = @transform_2, window_bounds = array<i64: 72, 8>}, {pipeline_mode = #tpu.pipeline_mode<synchronous>, transform_indices = @transform_3, window_bounds = array<i64: 1, 8>}, {pipeline_mode = #tpu.pipeline_mode<synchronous>, transform_indices = @transform_4, window_bounds = array<i64: 4, 8, 16>}, {pipeline_mode = #tpu.pipeline_mode<synchronous>, transform_indices = @transform_5, window_bounds = array<i64: 4, 8, 16>}, {pipeline_mode = #tpu.pipeline_mode<synchronous>, transform_indices = @transform_6, window_bounds = array<i64: 4, 8, 16>}, {pipeline_mode = #tpu.pipeline_mode<synchronous>, transform_indices = @transform_7, window_bounds = array<i64: 4, 16, 8>}, {pipeline_mode = #tpu.pipeline_mode<synchronous>, transform_indices = @transform_8, window_bounds = array<i64: 2, 1, 8>}, {transform_indices = @transform_9, window_bounds = array<i64: 1, 16, 8>}]} {
    %c0 = arith.constant 0 : index
    %c0_0 = arith.constant 0 : index
    %c0_1 = arith.constant 0 : index
    %0 = vector.load %arg1[%c0, %c0_0, %c0_1] : memref<1x16x72xf32, #tpu.memory_space<vmem>>, vector<1x16x72xf32>
    %1 = vector.shape_cast %0 : vector<1x16x72xf32> to vector<16x72xf32>
    %c0_2 = arith.constant 0 : index
    %c0_3 = arith.constant 0 : index
    %c0_4 = arith.constant 0 : index
    %2 = vector.load %arg2[%c0_2, %c0_3, %c0_4] : memref<1x64x8xf32, #tpu.memory_space<vmem>>, vector<1x64x8xf32>
    %3 = vector.shape_cast %2 : vector<1x64x8xf32> to vector<64x8xf32>
    %c0_5 = arith.constant 0 : index
    %c0_6 = arith.constant 0 : index
    %4 = vector.load %arg3[%c0_5, %c0_6] : memref<72x8xf32, #tpu.memory_space<vmem>>, vector<72x8xf32>
    %cst = arith.constant dense<0.000000e+00> : vector<16x8xf32>
    %5 = tpu.matmul %1, %4, %cst {dimension_numbers = #tpu.dot_dimension_numbers<[1], [0], [0], [1], [0, 0, 1, 1], [], []>} : vector<16x72xf32>, vector<72x8xf32>, vector<16x8xf32> -> vector<16x8xf32>
    %c0_7 = arith.constant 0 : index
    %c0_8 = arith.constant 0 : index
    %6 = vector.load %arg4[%c0_7, %c0_8] : memref<1x8xf32, #tpu.memory_space<vmem>>, vector<1x8xf32>
    %7 = vector.broadcast %6 : vector<1x8xf32> to vector<16x8xf32>
    %8 = arith.addf %5, %7 : vector<16x8xf32>
    %c0_9 = arith.constant 0 : index
    %c0_10 = arith.constant 0 : index
    %c0_11 = arith.constant 0 : index
    %9 = vector.load %arg9[%c0_9, %c0_10, %c0_11] : memref<2x1x8xf32, #tpu.memory_space<vmem>>, vector<1x1x8xf32>
    %10 = vector.shape_cast %9 : vector<1x1x8xf32> to vector<1x8xf32>
    %c0_12 = arith.constant 0 : index
    %c0_13 = arith.constant 0 : index
    %c0_14 = arith.constant 0 : index
    %11 = vector.load %arg5[%c0_12, %c0_13, %c0_14] : memref<4x8x16xf32, #tpu.memory_space<vmem>>, vector<1x8x16xf32>
    %12 = vector.shape_cast %11 : vector<1x8x16xf32> to vector<8x16xf32>
    %cst_15 = arith.constant dense<0.000000e+00> : vector<16x16xf32>
    %13 = tpu.matmul %8, %12, %cst_15 {dimension_numbers = #tpu.dot_dimension_numbers<[1], [0], [0], [1], [0, 0, 1, 1], [], []>} : vector<16x8xf32>, vector<8x16xf32>, vector<16x16xf32> -> vector<16x16xf32>
    %c0_16 = arith.constant 0 : index
    %c0_17 = arith.constant 0 : index
    %c0_18 = arith.constant 0 : index
    %14 = vector.load %arg6[%c0_16, %c0_17, %c0_18] : memref<4x8x16xf32, #tpu.memory_space<vmem>>, vector<1x8x16xf32>
    %15 = vector.shape_cast %14 : vector<1x8x16xf32> to vector<8x16xf32>
    %cst_19 = arith.constant dense<0.000000e+00> : vector<64x16xf32>
    %16 = tpu.matmul %3, %15, %cst_19 {dimension_numbers = #tpu.dot_dimension_numbers<[1], [0], [0], [1], [0, 0, 1, 1], [], []>} : vector<64x8xf32>, vector<8x16xf32>, vector<64x16xf32> -> vector<64x16xf32>
    %c0_20 = arith.constant 0 : index
    %c0_21 = arith.constant 0 : index
    %c0_22 = arith.constant 0 : index
    %17 = vector.load %arg7[%c0_20, %c0_21, %c0_22] : memref<4x8x16xf32, #tpu.memory_space<vmem>>, vector<1x8x16xf32>
    %18 = vector.shape_cast %17 : vector<1x8x16xf32> to vector<8x16xf32>
    %cst_23 = arith.constant dense<0.000000e+00> : vector<64x16xf32>
    %19 = tpu.matmul %3, %18, %cst_23 {dimension_numbers = #tpu.dot_dimension_numbers<[1], [0], [0], [1], [0, 0, 1, 1], [], []>} : vector<64x8xf32>, vector<8x16xf32>, vector<64x16xf32> -> vector<64x16xf32>
    %cst_24 = arith.constant dense<0.000000e+00> : vector<16x64xf32>
    %20 = tpu.matmul %13, %16, %cst_24 {dimension_numbers = #tpu.dot_dimension_numbers<[1], [1], [0], [0], [0, 0, 1, 0], [], []>} : vector<16x16xf32>, vector<64x16xf32>, vector<16x64xf32> -> vector<16x64xf32>
    %cst_25 = arith.constant dense<0xFF800000> : vector<16xf32>
    %21 = vector.multi_reduction <maximumf>, %20, %cst_25 [1] : vector<16x64xf32> to vector<16xf32>
    %22 = vector.shape_cast %21 : vector<16xf32> to vector<16x1xf32>
    %23 = vector.broadcast %22 : vector<16x1xf32> to vector<16x64xf32>
    %24 = arith.subf %20, %23 : vector<16x64xf32>
    %25 = math.exp %24 : vector<16x64xf32>
    %cst_26 = arith.constant dense<0.000000e+00> : vector<16xf32>
    %26 = vector.multi_reduction <add>, %25, %cst_26 [1] : vector<16x64xf32> to vector<16xf32>
    %27 = vector.shape_cast %26 : vector<16xf32> to vector<16x1xf32>
    %28 = tpu.reciprocal %27 {approx = true} : vector<16x1xf32> -> vector<16x1xf32>
    %29 = vector.broadcast %28 : vector<16x1xf32> to vector<16x64xf32>
    %30 = arith.mulf %25, %29 : vector<16x64xf32>
    %cst_27 = arith.constant dense<0.000000e+00> : vector<16x16xf32>
    %31 = tpu.matmul %30, %19, %cst_27 {dimension_numbers = #tpu.dot_dimension_numbers<[1], [0], [0], [1], [0, 0, 1, 1], [], []>} : vector<16x64xf32>, vector<64x16xf32>, vector<16x16xf32> -> vector<16x16xf32>
    %c0_28 = arith.constant 0 : index
    %c0_29 = arith.constant 0 : index
    %c0_30 = arith.constant 0 : index
    %32 = vector.load %arg8[%c0_28, %c0_29, %c0_30] : memref<4x16x8xf32, #tpu.memory_space<vmem>>, vector<1x16x8xf32>
    %33 = vector.shape_cast %32 : vector<1x16x8xf32> to vector<16x8xf32>
    %cst_31 = arith.constant dense<0.000000e+00> : vector<16x8xf32>
    %34 = tpu.matmul %31, %33, %cst_31 {dimension_numbers = #tpu.dot_dimension_numbers<[1], [0], [0], [1], [0, 0, 1, 1], [], []>} : vector<16x16xf32>, vector<16x8xf32>, vector<16x8xf32> -> vector<16x8xf32>
    %35 = vector.broadcast %10 : vector<1x8xf32> to vector<16x8xf32>
    %36 = arith.addf %35, %34 : vector<16x8xf32>
    %c1 = arith.constant 1 : index
    %c0_32 = arith.constant 0 : index
    %c0_33 = arith.constant 0 : index
    %37 = vector.load %arg5[%c1, %c0_32, %c0_33] : memref<4x8x16xf32, #tpu.memory_space<vmem>>, vector<1x8x16xf32>
    %38 = vector.shape_cast %37 : vector<1x8x16xf32> to vector<8x16xf32>
    %cst_34 = arith.constant dense<0.000000e+00> : vector<16x16xf32>
    %39 = tpu.matmul %8, %38, %cst_34 {dimension_numbers = #tpu.dot_dimension_numbers<[1], [0], [0], [1], [0, 0, 1, 1], [], []>} : vector<16x8xf32>, vector<8x16xf32>, vector<16x16xf32> -> vector<16x16xf32>
    %c1_35 = arith.constant 1 : index
    %c0_36 = arith.constant 0 : index
    %c0_37 = arith.constant 0 : index
    %40 = vector.load %arg6[%c1_35, %c0_36, %c0_37] : memref<4x8x16xf32, #tpu.memory_space<vmem>>, vector<1x8x16xf32>
    %41 = vector.shape_cast %40 : vector<1x8x16xf32> to vector<8x16xf32>
    %cst_38 = arith.constant dense<0.000000e+00> : vector<64x16xf32>
    %42 = tpu.matmul %3, %41, %cst_38 {dimension_numbers = #tpu.dot_dimension_numbers<[1], [0], [0], [1], [0, 0, 1, 1], [], []>} : vector<64x8xf32>, vector<8x16xf32>, vector<64x16xf32> -> vector<64x16xf32>
    %c1_39 = arith.constant 1 : index
    %c0_40 = arith.constant 0 : index
    %c0_41 = arith.constant 0 : index
    %43 = vector.load %arg7[%c1_39, %c0_40, %c0_41] : memref<4x8x16xf32, #tpu.memory_space<vmem>>, vector<1x8x16xf32>
    %44 = vector.shape_cast %43 : vector<1x8x16xf32> to vector<8x16xf32>
    %cst_42 = arith.constant dense<0.000000e+00> : vector<64x16xf32>
    %45 = tpu.matmul %3, %44, %cst_42 {dimension_numbers = #tpu.dot_dimension_numbers<[1], [0], [0], [1], [0, 0, 1, 1], [], []>} : vector<64x8xf32>, vector<8x16xf32>, vector<64x16xf32> -> vector<64x16xf32>
    %cst_43 = arith.constant dense<0.000000e+00> : vector<16x64xf32>
    %46 = tpu.matmul %39, %42, %cst_43 {dimension_numbers = #tpu.dot_dimension_numbers<[1], [1], [0], [0], [0, 0, 1, 0], [], []>} : vector<16x16xf32>, vector<64x16xf32>, vector<16x64xf32> -> vector<16x64xf32>
    %cst_44 = arith.constant dense<0xFF800000> : vector<16xf32>
    %47 = vector.multi_reduction <maximumf>, %46, %cst_44 [1] : vector<16x64xf32> to vector<16xf32>
    %48 = vector.shape_cast %47 : vector<16xf32> to vector<16x1xf32>
    %49 = vector.broadcast %48 : vector<16x1xf32> to vector<16x64xf32>
    %50 = arith.subf %46, %49 : vector<16x64xf32>
    %51 = math.exp %50 : vector<16x64xf32>
    %cst_45 = arith.constant dense<0.000000e+00> : vector<16xf32>
    %52 = vector.multi_reduction <add>, %51, %cst_45 [1] : vector<16x64xf32> to vector<16xf32>
    %53 = vector.shape_cast %52 : vector<16xf32> to vector<16x1xf32>
    %54 = tpu.reciprocal %53 {approx = true} : vector<16x1xf32> -> vector<16x1xf32>
    %55 = vector.broadcast %54 : vector<16x1xf32> to vector<16x64xf32>
    %56 = arith.mulf %51, %55 : vector<16x64xf32>
    %cst_46 = arith.constant dense<0.000000e+00> : vector<16x16xf32>
    %57 = tpu.matmul %56, %45, %cst_46 {dimension_numbers = #tpu.dot_dimension_numbers<[1], [0], [0], [1], [0, 0, 1, 1], [], []>} : vector<16x64xf32>, vector<64x16xf32>, vector<16x16xf32> -> vector<16x16xf32>
    %c1_47 = arith.constant 1 : index
    %c0_48 = arith.constant 0 : index
    %c0_49 = arith.constant 0 : index
    %58 = vector.load %arg8[%c1_47, %c0_48, %c0_49] : memref<4x16x8xf32, #tpu.memory_space<vmem>>, vector<1x16x8xf32>
    %59 = vector.shape_cast %58 : vector<1x16x8xf32> to vector<16x8xf32>
    %cst_50 = arith.constant dense<0.000000e+00> : vector<16x8xf32>
    %60 = tpu.matmul %57, %59, %cst_50 {dimension_numbers = #tpu.dot_dimension_numbers<[1], [0], [0], [1], [0, 0, 1, 1], [], []>} : vector<16x16xf32>, vector<16x8xf32>, vector<16x8xf32> -> vector<16x8xf32>
    %61 = arith.addf %36, %60 : vector<16x8xf32>
    %62 = arith.addf %61, %8 : vector<16x8xf32>
    %c1_51 = arith.constant 1 : index
    %c0_52 = arith.constant 0 : index
    %c0_53 = arith.constant 0 : index
    %63 = vector.load %arg9[%c1_51, %c0_52, %c0_53] : memref<2x1x8xf32, #tpu.memory_space<vmem>>, vector<1x1x8xf32>
    %64 = vector.shape_cast %63 : vector<1x1x8xf32> to vector<1x8xf32>
    %c2 = arith.constant 2 : index
    %c0_54 = arith.constant 0 : index
    %c0_55 = arith.constant 0 : index
    %65 = vector.load %arg5[%c2, %c0_54, %c0_55] : memref<4x8x16xf32, #tpu.memory_space<vmem>>, vector<1x8x16xf32>
    %66 = vector.shape_cast %65 : vector<1x8x16xf32> to vector<8x16xf32>
    %cst_56 = arith.constant dense<0.000000e+00> : vector<16x16xf32>
    %67 = tpu.matmul %62, %66, %cst_56 {dimension_numbers = #tpu.dot_dimension_numbers<[1], [0], [0], [1], [0, 0, 1, 1], [], []>} : vector<16x8xf32>, vector<8x16xf32>, vector<16x16xf32> -> vector<16x16xf32>
    %c2_57 = arith.constant 2 : index
    %c0_58 = arith.constant 0 : index
    %c0_59 = arith.constant 0 : index
    %68 = vector.load %arg6[%c2_57, %c0_58, %c0_59] : memref<4x8x16xf32, #tpu.memory_space<vmem>>, vector<1x8x16xf32>
    %69 = vector.shape_cast %68 : vector<1x8x16xf32> to vector<8x16xf32>
    %cst_60 = arith.constant dense<0.000000e+00> : vector<64x16xf32>
    %70 = tpu.matmul %3, %69, %cst_60 {dimension_numbers = #tpu.dot_dimension_numbers<[1], [0], [0], [1], [0, 0, 1, 1], [], []>} : vector<64x8xf32>, vector<8x16xf32>, vector<64x16xf32> -> vector<64x16xf32>
    %c2_61 = arith.constant 2 : index
    %c0_62 = arith.constant 0 : index
    %c0_63 = arith.constant 0 : index
    %71 = vector.load %arg7[%c2_61, %c0_62, %c0_63] : memref<4x8x16xf32, #tpu.memory_space<vmem>>, vector<1x8x16xf32>
    %72 = vector.shape_cast %71 : vector<1x8x16xf32> to vector<8x16xf32>
    %cst_64 = arith.constant dense<0.000000e+00> : vector<64x16xf32>
    %73 = tpu.matmul %3, %72, %cst_64 {dimension_numbers = #tpu.dot_dimension_numbers<[1], [0], [0], [1], [0, 0, 1, 1], [], []>} : vector<64x8xf32>, vector<8x16xf32>, vector<64x16xf32> -> vector<64x16xf32>
    %cst_65 = arith.constant dense<0.000000e+00> : vector<16x64xf32>
    %74 = tpu.matmul %67, %70, %cst_65 {dimension_numbers = #tpu.dot_dimension_numbers<[1], [1], [0], [0], [0, 0, 1, 0], [], []>} : vector<16x16xf32>, vector<64x16xf32>, vector<16x64xf32> -> vector<16x64xf32>
    %cst_66 = arith.constant dense<0xFF800000> : vector<16xf32>
    %75 = vector.multi_reduction <maximumf>, %74, %cst_66 [1] : vector<16x64xf32> to vector<16xf32>
    %76 = vector.shape_cast %75 : vector<16xf32> to vector<16x1xf32>
    %77 = vector.broadcast %76 : vector<16x1xf32> to vector<16x64xf32>
    %78 = arith.subf %74, %77 : vector<16x64xf32>
    %79 = math.exp %78 : vector<16x64xf32>
    %cst_67 = arith.constant dense<0.000000e+00> : vector<16xf32>
    %80 = vector.multi_reduction <add>, %79, %cst_67 [1] : vector<16x64xf32> to vector<16xf32>
    %81 = vector.shape_cast %80 : vector<16xf32> to vector<16x1xf32>
    %82 = tpu.reciprocal %81 {approx = true} : vector<16x1xf32> -> vector<16x1xf32>
    %83 = vector.broadcast %82 : vector<16x1xf32> to vector<16x64xf32>
    %84 = arith.mulf %79, %83 : vector<16x64xf32>
    %cst_68 = arith.constant dense<0.000000e+00> : vector<16x16xf32>
    %85 = tpu.matmul %84, %73, %cst_68 {dimension_numbers = #tpu.dot_dimension_numbers<[1], [0], [0], [1], [0, 0, 1, 1], [], []>} : vector<16x64xf32>, vector<64x16xf32>, vector<16x16xf32> -> vector<16x16xf32>
    %c2_69 = arith.constant 2 : index
    %c0_70 = arith.constant 0 : index
    %c0_71 = arith.constant 0 : index
    %86 = vector.load %arg8[%c2_69, %c0_70, %c0_71] : memref<4x16x8xf32, #tpu.memory_space<vmem>>, vector<1x16x8xf32>
    %87 = vector.shape_cast %86 : vector<1x16x8xf32> to vector<16x8xf32>
    %cst_72 = arith.constant dense<0.000000e+00> : vector<16x8xf32>
    %88 = tpu.matmul %85, %87, %cst_72 {dimension_numbers = #tpu.dot_dimension_numbers<[1], [0], [0], [1], [0, 0, 1, 1], [], []>} : vector<16x16xf32>, vector<16x8xf32>, vector<16x8xf32> -> vector<16x8xf32>
    %89 = vector.broadcast %64 : vector<1x8xf32> to vector<16x8xf32>
    %90 = arith.addf %89, %88 : vector<16x8xf32>
    %c3 = arith.constant 3 : index
    %c0_73 = arith.constant 0 : index
    %c0_74 = arith.constant 0 : index
    %91 = vector.load %arg5[%c3, %c0_73, %c0_74] : memref<4x8x16xf32, #tpu.memory_space<vmem>>, vector<1x8x16xf32>
    %92 = vector.shape_cast %91 : vector<1x8x16xf32> to vector<8x16xf32>
    %cst_75 = arith.constant dense<0.000000e+00> : vector<16x16xf32>
    %93 = tpu.matmul %62, %92, %cst_75 {dimension_numbers = #tpu.dot_dimension_numbers<[1], [0], [0], [1], [0, 0, 1, 1], [], []>} : vector<16x8xf32>, vector<8x16xf32>, vector<16x16xf32> -> vector<16x16xf32>
    %c3_76 = arith.constant 3 : index
    %c0_77 = arith.constant 0 : index
    %c0_78 = arith.constant 0 : index
    %94 = vector.load %arg6[%c3_76, %c0_77, %c0_78] : memref<4x8x16xf32, #tpu.memory_space<vmem>>, vector<1x8x16xf32>
    %95 = vector.shape_cast %94 : vector<1x8x16xf32> to vector<8x16xf32>
    %cst_79 = arith.constant dense<0.000000e+00> : vector<64x16xf32>
    %96 = tpu.matmul %3, %95, %cst_79 {dimension_numbers = #tpu.dot_dimension_numbers<[1], [0], [0], [1], [0, 0, 1, 1], [], []>} : vector<64x8xf32>, vector<8x16xf32>, vector<64x16xf32> -> vector<64x16xf32>
    %c3_80 = arith.constant 3 : index
    %c0_81 = arith.constant 0 : index
    %c0_82 = arith.constant 0 : index
    %97 = vector.load %arg7[%c3_80, %c0_81, %c0_82] : memref<4x8x16xf32, #tpu.memory_space<vmem>>, vector<1x8x16xf32>
    %98 = vector.shape_cast %97 : vector<1x8x16xf32> to vector<8x16xf32>
    %cst_83 = arith.constant dense<0.000000e+00> : vector<64x16xf32>
    %99 = tpu.matmul %3, %98, %cst_83 {dimension_numbers = #tpu.dot_dimension_numbers<[1], [0], [0], [1], [0, 0, 1, 1], [], []>} : vector<64x8xf32>, vector<8x16xf32>, vector<64x16xf32> -> vector<64x16xf32>
    %cst_84 = arith.constant dense<0.000000e+00> : vector<16x64xf32>
    %100 = tpu.matmul %93, %96, %cst_84 {dimension_numbers = #tpu.dot_dimension_numbers<[1], [1], [0], [0], [0, 0, 1, 0], [], []>} : vector<16x16xf32>, vector<64x16xf32>, vector<16x64xf32> -> vector<16x64xf32>
    %cst_85 = arith.constant dense<0xFF800000> : vector<16xf32>
    %101 = vector.multi_reduction <maximumf>, %100, %cst_85 [1] : vector<16x64xf32> to vector<16xf32>
    %102 = vector.shape_cast %101 : vector<16xf32> to vector<16x1xf32>
    %103 = vector.broadcast %102 : vector<16x1xf32> to vector<16x64xf32>
    %104 = arith.subf %100, %103 : vector<16x64xf32>
    %105 = math.exp %104 : vector<16x64xf32>
    %cst_86 = arith.constant dense<0.000000e+00> : vector<16xf32>
    %106 = vector.multi_reduction <add>, %105, %cst_86 [1] : vector<16x64xf32> to vector<16xf32>
    %107 = vector.shape_cast %106 : vector<16xf32> to vector<16x1xf32>
    %108 = tpu.reciprocal %107 {approx = true} : vector<16x1xf32> -> vector<16x1xf32>
    %109 = vector.broadcast %108 : vector<16x1xf32> to vector<16x64xf32>
    %110 = arith.mulf %105, %109 : vector<16x64xf32>
    %cst_87 = arith.constant dense<0.000000e+00> : vector<16x16xf32>
    %111 = tpu.matmul %110, %99, %cst_87 {dimension_numbers = #tpu.dot_dimension_numbers<[1], [0], [0], [1], [0, 0, 1, 1], [], []>} : vector<16x64xf32>, vector<64x16xf32>, vector<16x16xf32> -> vector<16x16xf32>
    %c3_88 = arith.constant 3 : index
    %c0_89 = arith.constant 0 : index
    %c0_90 = arith.constant 0 : index
    %112 = vector.load %arg8[%c3_88, %c0_89, %c0_90] : memref<4x16x8xf32, #tpu.memory_space<vmem>>, vector<1x16x8xf32>
    %113 = vector.shape_cast %112 : vector<1x16x8xf32> to vector<16x8xf32>
    %cst_91 = arith.constant dense<0.000000e+00> : vector<16x8xf32>
    %114 = tpu.matmul %111, %113, %cst_91 {dimension_numbers = #tpu.dot_dimension_numbers<[1], [0], [0], [1], [0, 0, 1, 1], [], []>} : vector<16x16xf32>, vector<16x8xf32>, vector<16x8xf32> -> vector<16x8xf32>
    %115 = arith.addf %90, %114 : vector<16x8xf32>
    %116 = arith.addf %115, %62 : vector<16x8xf32>
    %117 = arith.addf %116, %8 : vector<16x8xf32>
    %c0_92 = arith.constant 0 : index
    %c0_93 = arith.constant 0 : index
    %c0_94 = arith.constant 0 : index
    %118 = vector.load %arg10[%c0_92, %c0_93, %c0_94] : memref<1x16x8xf32, #tpu.memory_space<vmem>>, vector<1x16x8xf32>
    %119 = vector.shape_cast %118 : vector<1x16x8xf32> to vector<16x8xf32>
    %120 = vector.shape_cast %117 : vector<16x8xf32> to vector<1x16x8xf32>
    tpu.vector_store %arg10[%c0_92, %c0_93, %c0_94], %120 {strides = array<i32>} : memref<1x16x8xf32, #tpu.memory_space<vmem>>, vector<1x16x8xf32>,
    return
  }
  func.func @transform_0(%arg0: i32) -> (i32, i32, i32) {
    %c0_i32 = arith.constant 0 : i32
    %c0_i32_0 = arith.constant 0 : i32
    %c0_i32_1 = arith.constant 0 : i32
    return %arg0, %c0_i32, %c0_i32_0 : i32, i32, i32
  }
  func.func @transform_1(%arg0: i32) -> (i32, i32, i32) {
    %c0_i32 = arith.constant 0 : i32
    %c0_i32_0 = arith.constant 0 : i32
    %c0_i32_1 = arith.constant 0 : i32
    return %arg0, %c0_i32, %c0_i32_0 : i32, i32, i32
  }
  func.func @transform_2(%arg0: i32) -> (i32, i32) {
    %c0_i32 = arith.constant 0 : i32
    %c0_i32_0 = arith.constant 0 : i32
    %c0_i32_1 = arith.constant 0 : i32
    return %c0_i32, %c0_i32_0 : i32, i32
  }
  func.func @transform_3(%arg0: i32) -> (i32, i32) {
    %c0_i32 = arith.constant 0 : i32
    %c0_i32_0 = arith.constant 0 : i32
    %c0_i32_1 = arith.constant 0 : i32
    return %c0_i32, %c0_i32_0 : i32, i32
  }
  func.func @transform_4(%arg0: i32) -> (i32, i32, i32) {
    %c0_i32 = arith.constant 0 : i32
    %c0_i32_0 = arith.constant 0 : i32
    %c0_i32_1 = arith.constant 0 : i32
    %c0_i32_2 = arith.constant 0 : i32
    return %c0_i32, %c0_i32_0, %c0_i32_1 : i32, i32, i32
  }
  func.func @transform_5(%arg0: i32) -> (i32, i32, i32) {
    %c0_i32 = arith.constant 0 : i32
    %c0_i32_0 = arith.constant 0 : i32
    %c0_i32_1 = arith.constant 0 : i32
    %c0_i32_2 = arith.constant 0 : i32
    return %c0_i32, %c0_i32_0, %c0_i32_1 : i32, i32, i32
  }
  func.func @transform_6(%arg0: i32) -> (i32, i32, i32) {
    %c0_i32 = arith.constant 0 : i32
    %c0_i32_0 = arith.constant 0 : i32
    %c0_i32_1 = arith.constant 0 : i32
    %c0_i32_2 = arith.constant 0 : i32
    return %c0_i32, %c0_i32_0, %c0_i32_1 : i32, i32, i32
  }
  func.func @transform_7(%arg0: i32) -> (i32, i32, i32) {
    %c0_i32 = arith.constant 0 : i32
    %c0_i32_0 = arith.constant 0 : i32
    %c0_i32_1 = arith.constant 0 : i32
    %c0_i32_2 = arith.constant 0 : i32
    return %c0_i32, %c0_i32_0, %c0_i32_1 : i32, i32, i32
  }
  func.func @transform_8(%arg0: i32) -> (i32, i32, i32) {
    %c0_i32 = arith.constant 0 : i32
    %c0_i32_0 = arith.constant 0 : i32
    %c0_i32_1 = arith.constant 0 : i32
    %c0_i32_2 = arith.constant 0 : i32
    return %c0_i32, %c0_i32_0, %c0_i32_1 : i32, i32, i32
  }
  func.func @transform_9(%arg0: i32) -> (i32, i32, i32) {
    %c0_i32 = arith.constant 0 : i32
    %c0_i32_0 = arith.constant 0 : i32
    %c0_i32_1 = arith.constant 0 : i32
    return %arg0, %c0_i32, %c0_i32_0 : i32, i32, i32
  }
}

</mosaic_0001>

<bundles_post_ra>
// kernel: convtransformer_forward.1
= control target key start
LH: loop header
LB: loop body
LE: loop exit
PB: predicated region body
PF: predicated region fallthrough
CT: control target
= control target key end

     0   :  { %14 = vsyncpa [#allocation3], 0  ;;  %s4528_s0 = inlined_call_operand.vmem [shape: f32[2,16,72], index: 0, kind: input, shape index: {}]   ;;  %s4529_s1 = inlined_call_operand.vmem [shape: f32[2,64,8], index: 1, kind: input, shape index: {}]   ;;  %s4530_s2 = inlined_call_operand.vmem [shape: f32[72,8], index: 2, kind: input, shape index: {}]   ;;  %s4531_s3 = inlined_call_operand.vmem [shape: f32[1,8], index: 3, kind: input, shape index: {}]   ;;  %s4532_s4 = inlined_call_operand.vmem [shape: f32[4,8,16], index: 4, kind: input, shape index: {}]   ;;  %s4533_s5 = inlined_call_operand.vmem [shape: f32[4,8,16], index: 5, kind: input, shape index: {}]   ;;  %s4534_s6 = inlined_call_operand.vmem [shape: f32[4,8,16], index: 6, kind: input, shape index: {}]   ;;  %s4535_s7 = inlined_call_operand.vmem [shape: f32[4,16,8], index: 7, kind: input, shape index: {}]   ;;  %s4536_s8 = inlined_call_operand.vmem [shape: f32[2,1,8], index: 8, kind: input, shape index: {}]   ;;  %s4537_s9 = inlined_call_operand.hbm [shape: f32[2,16,8], index: 9, kind: output, shape index: {}]  }
   0x1   :  { %16 = vsyncpa [#allocation3 + $0x1], 0  ;;  %s4025_s30 = smov 0   ;;  %s4027_s10 = smov 0  }
   0x2   :  { %s4029_s11 = smov 0   ;;  %s4031_s12 = smov 0  }
   0x3 LB: > { %s4046_s13 = sadd.s32 4294967295, %s3970_s12   ;;  %s2945_s14 = sadd.s32 4294967294, %s3970_s12   ;;  %s3970_s12 = sphi %s4031_s12, %s4545_s12   ;;  %s3966_s11 = sphi %s4029_s11, %s4544_s11   ;;  %s3962_s10 = sphi %s4027_s10, %s4543_s10   ;;  %s3958_s30 = sphi %s4025_s30, %s4542_s30  }
   0x4   : > { %s4050_s15 = sadd.s32 1, %s3970_s12   ;;  %s228_s16 = sadd.s32 1, %s3966_s11 }
   0x5   : > { %s225_s17 = ssub.s32 %s3970_s12, %s4050_s15  ;;  %p238_p0 = scmp.ne.s32.totalorder %s3966_s11, %s3962_s10 }
   0x6   : > { %p226_p1 = scmp.eq.s32.totalorder %s225_s17, 0  ;;  %p239_p2 = scmp.eq.s32.totalorder %s4046_s13, 1 }
   0x7   : > { %p244_p3 = scmp.ne.s32.totalorder %s3962_s10, %s3958_s30  ;;  %p245_p4 = scmp.eq.s32.totalorder %s2945_s14, 1 }
   0x8   : > { %s4061_s18 = scalar_select %p226_p1, %s3966_s11, %s228_s16  }
   0x9   : > { %p4063_p5 = por %p239_p2, %p238_p0  ;;  %p4067_p6 = por %p245_p4, %p244_p3 }
   0xa   : > { %p2948_p7 = scmp.ge.s32.totalorder %s3970_s12, 1  ;;  %p300_p8 = scmp.lt.s32.totalorder %s3970_s12, 3 }
   0xc   : > { %p301_p9 = pnand %p2948_p7, %p300_p8 }
   0xd   : > { %v361_v0 = vld [vmem:[%s4530_s2] sm:$0xff] (!%p301_p9)  ;;  %v362_v1 = vld [vmem:[%s4530_s2 + $0x8] sm:$0xff] (!%p301_p9)  ;;  %v363_v2 = vld [vmem:[%s4530_s2 + $0x10] sm:$0xff] (!%p301_p9)  ;;  %p341_p10 = scmp.lt.s32.totalorder (!%p301_p9), %s4046_s13, 1  ;;  %vm377_vm0 = vcmask (!%p301_p9), 588800   ;;  %vm461_vm1 = vcmask (!%p301_p9), 64512  }
   0xe   : > { %304 = sbr.rel (%p301_p9) target bundleno = 4677 (0x1245), region = 56  ;;  %v3635_v3 = vpack.c.bf16 (!%p301_p9), %v362_v1, %v361_v0  ;;  %v364_v4 = vld [vmem:[%s4530_s2 + $0x18] sm:$0xff] (!%p301_p9)  ;;  %v365_v6 = vld [vmem:[%s4530_s2 + $0x20] sm:$0xff] (!%p301_p9)  ;;  %v366_v7 = vld [vmem:[%s4530_s2 + $0x28] sm:$0xff] (!%p301_p9)  ;;  %vm779_vm2 = vcmask (!%p301_p9), 130048   ;;  %vm885_vm4 = vcmask (!%p301_p9), 523264  }
   0xf   : > { %v3639_v5 = vpack.c.bf16 (!%p301_p9), %v364_v4, %v363_v2  ;;  %v3643_v8 = vpack.c.bf16 (!%p301_p9), %v366_v7, %v365_v6  ;;  %v367_v9 = vld [vmem:[%s4530_s2 + $0x30] sm:$0xff] (!%p301_p9)  ;;  %v368_v10 = vld [vmem:[%s4530_s2 + $0x38] sm:$0xff] (!%p301_p9)  ;;  %v369_v13 = vld [vmem:[%s4530_s2 + $0x40] sm:$0xff] (!%p301_p9)  ;;  %s338_s17 = sand.u32 (!%p301_p9), 1, %s3962_s10   ;;  %s3972_s16 = smov (!%p301_p9), [#allocation2]  }
  0x10   : > { %3636 = vmatprep.subr.bf16.mxu0 (!%p301_p9), %v3635_v3  ;;  %v3647_v12 = vpack.c.bf16 (!%p301_p9), %v368_v10, %v367_v9  ;;  %v460_v15 = vld [vmem:[%s4532_s4] sm:$0xff] (!%p301_p9)  ;;  %vm4185_vm3 = vmpackc.low (!%p301_p9), %vm779_vm2, %vm779_vm2  ;;  %v2990_v55 = vld [vmem:[%s4532_s4 + $0x8] sm:$0xff] (!%p301_p9) }
  0x11   : > { %3638 = vmatpush3.bf16.msra.mxu0 (!%p301_p9), %v3635_v3  ;;  %3323 = vmatprep.subr.mxu1 (!%p301_p9), %v460_v15  ;;  %v543_v16 = vld [vmem:[%s4533_s5] sm:$0xff] (!%p301_p9) }
  0x12   : > { %3640 = vmatprep.subr.bf16.mxu0 (!%p301_p9), %v3639_v5  ;;  %3324 = vmatpush3.msra.mxu1 (!%p301_p9), %v460_v15  ;;  %v2954_v17 = vld [vmem:[%s4531_s3] ss:$0 sm:$0xff] (!%p301_p9) }
  0x13   : > { %3328 = vmatprep.subr.mxu1 (!%p301_p9), %v543_v16  ;;  %v673_v23 = vld [vmem:[%s4534_s6] sm:$0xff] (!%p301_p9) }
  0x15   : > { %s4093_s21 = scalar_select %p341_p10, %s4046_s13, 1  ;;  %3642 = vmatpush3.bf16.msra.mxu0 %v3639_v5 }
  0x16   : > { %3644 = vmatprep.subr.bf16.mxu0 %v3643_v8 }
  0x17   : > { %s3108_s22 = sshll.u32 %s4093_s21, 4  ;;  %s3109_s26 = sshll.u32 %s4093_s21, 6 }
  0x18   : > { %s345_s25 = scalar_lea.vmem %s4528_s0, %s3108_s22  ;;  %s350_s14 = scalar_lea.vmem %s4529_s1, %s3109_s26 }
  0x19   : > { %v351_v11 = vld [vmem:[%s345_s25] sm:$0xff]  ;;  %3646 = vmatpush3.bf16.msra.mxu0 %v3643_v8  ;;  %v352_v14 = vld [vmem:[%s345_s25 + $0x8] sm:$0xff]  ;;  %v4140_v25 = vld [vmem:[%s350_s14 + $0x10] sm:$0xff]  ;;  %s2949_s22 = sshll.u32 %s338_s17, 4  ;;  %s3110_s26 = sshll.u32 %s4046_s13, 8 }
  0x1a   : > { %3320 = vmatprep.mubr.msk.f32.mxu0 %vm377_vm0, %v351_v11  ;;  %3648 = vmatprep.subr.bf16.mxu0 %v3647_v12  ;;  %v4127_v22 = vld [vmem:[%s350_s14] sm:$0xff]  ;;  %v4138_v24 = vld [vmem:[%s350_s14 + $0x8] sm:$0xff]  ;;  %v4146_v26 = vld [vmem:[%s350_s14 + $0x18] sm:$0xff]  ;;  %s340_s27 = scalar_lea.vmem [#allocation2], %s2949_s22  ;;  %s4487_s13 = scalar_lea.sflag [#allocation3], %s338_s17 }
  0x1b   : > { %v4148_v27 = vld [vmem:[%s350_s14 + $0x20] sm:$0xff]  ;;  %v4154_v28 = vld [vmem:[%s350_s14 + $0x28] sm:$0xff]  ;;  %v4156_v29 = vld [vmem:[%s350_s14 + $0x30] sm:$0xff]  ;;  %s2871_s28 = sshll.u32 %s340_s27, 4  ;;  %s3912_s22 = sshll.u32 %s3972_s16, 4  ;;  %s4482_s28 = int_to_ptr.vmem [resolvable:$true] %s2871_s28  ;;  %s3913_s22 = int_to_ptr.vmem [resolvable:$false] %s3912_s22 }
  0x1c   : > { %v4162_v30 = vld [vmem:[%s350_s14 + $0x38] sm:$0xff]  ;;  %v989_v11 = vld [vmem:[%s4535_s7] sm:$0xff]  ;;  %s4480_s14 = scalar_lea.hbm %s4537_s9, %s3110_s26  ;;  %s3908_s21 = scalar_lea.vmem %s4482_s28, 256 }
  0x1d   : > { %3650 = vmatpush3.bf16.msra.mxu0 %v3647_v12  ;;  %v990_v12 = vld [vmem:[%s4535_s7 + $0x8] sm:$0xff]  ;;  %p3909_p11 = scmp.ne.s32.totalorder %s4482_s28, %s3908_s21  ;;  %s3914_s23 = scalar_lea.vmem %s3913_s22, 512 }
  0x1e   : > { %3318 = vmatprep.subr.mxu0 %v369_v13  ;;  %p3915_p0 = scmp.lt.s32.totalorder %s4482_s28, %s3913_s22  ;;  %p3916_p1 = scmp.lt.s32.totalorder %s3914_s23, %s3908_s21 }
  0x1f   : > { %p3910_p12 = pnand %p3909_p11, %p4063_p5 }
  0x20   : > { %p3917_p2 = por %p3916_p1, %p3915_p0 }
  0x21   : > { %3319 = vmatpush3.msra.mxu0 %v369_v13  ;;  %v3691_v13 = vpack.c.bf16 %v990_v12, %v989_v11  ;;  %p3911_p13 = pneg %p3910_p12 }
  0x22   : > { %3321 = vmatmul.mubr.msk.f32.vlgmr.msra.gmra.mrb[0].mxu0 %vm377_vm0, %v352_v14 }
  0x23   : > { %p3918_p3 = pnand %p3917_p2, %p3911_p13 }
  0xf5   : > { %v3322_v18 = vpop.f32.mrb[0].mxu0 }
  0xf6   : > { %v450_v19 = vpop.f32.mrb[1].mxu0  ;;  %v4125_v21 = vadd.f32 %v3322_v18, %v2954_v17 }
  0xf7   : > { %v4123_v20 = vadd.f32 %v2954_v17, %v450_v19 }
  0xf9   : > { %3325 = vmatprep.mubr.msk.f32.mxu1 %vm461_vm1, %v4123_v20 }
  0xfa   : > { %3326 = vmatmul.mubr.msk.f32.vlgmr.msra.gmra.mrb[0].mxu1 %vm461_vm1, %v4125_v21 }
  0xfb   : > { %3329 = vmatpush3.msra.mxu1 %v543_v16  ;;  %3330 = vmatprep.mubr.msk.f32.mxu1 %vm461_vm1, %v4127_v22 }
  0xfc   : > { %3342 = vmatprep.subr.mxu1 %v673_v23 }
  0xfe   : > { %3331 = vmatmul.mubr.msk.f32.vlgmr.msra.gmra.mrb[2].mxu1 %vm461_vm1, %v4138_v24 }
  0xff   : > { %3333 = vmatprep.mubr.msk.f32.mxu1 %vm461_vm1, %v4140_v25  ;;  %3343 = vmatpush3.msra.mxu1 %v673_v23  ;;  %v2993_v23 = vld [vmem:[%s4533_s5 + $0x8] sm:$0xff] }
 0x102   : > { %3334 = vmatmul.mubr.msk.f32.gmra.mrb[4].mxu1 %vm461_vm1, %v4146_v26 }
 0x103   : > { %3336 = vmatprep.mubr.msk.f32.mxu1 %vm461_vm1, %v4148_v27 }
 0x106   : > { %3337 = vmatmul.mubr.msk.f32.gmra.mrb[6].mxu1 %vm461_vm1, %v4154_v28 }
 0x107   : > { %3339 = vmatprep.mubr.msk.f32.mxu1 %vm461_vm1, %v4156_v29 }
 0x10a   : > { %3340 = vmatmul.mubr.msk.f32.gmra.mrb[8].mxu1 %vm461_vm1, %v4162_v30 }
 0x10b   : > { %3344 = vmatprep.mubr.msk.f32.mxu1 %vm461_vm1, %v4127_v22 }
 0x10e   : > { %3345 = vmatmul.mubr.msk.f32.vlgmr.msra.gmra.mrb[10].mxu1 %vm461_vm1, %v4138_v24 }
 0x10f   : > { %3347 = vmatprep.mubr.msk.f32.mxu1 %vm461_vm1, %v4140_v25 }
 0x112   : > { %3348 = vmatmul.mubr.msk.f32.gmra.mrb[12].mxu1 %vm461_vm1, %v4146_v26 }
 0x113   : > { %3350 = vmatprep.mubr.msk.f32.mxu1 %vm461_vm1, %v4148_v27 }
 0x116   : > { %3351 = vmatmul.mubr.msk.f32.gmra.mrb[14].mxu1 %vm461_vm1, %v4154_v28 }
 0x117   : > { %3353 = vmatprep.mubr.msk.f32.mxu1 %vm461_vm1, %v4156_v29 }
 0x11a   : > { %3354 = vmatmul.mubr.msk.f32.gmra.mrb[16].mxu1 %vm461_vm1, %v4162_v30 }
 0x1cd   : > { %v3327_v31 = vpop.f32.mrb[0].mxu1 }
 0x1ce   : > { %v534_v32 = vpop.f32.mrb[1].mxu1 }
 0x1cf   : > { %3372 = vmatprep.mubr.msk.f32.mxu1 %vm779_vm2, %v534_v32 }
 0x1d1   : > { %v3332_v33 = vpop.f32.mrb[2].mxu1 }
 0x1d2   : > { %v634_v35 = vpop.f32.mrb[3].mxu1 }
 0x1d3   : > { %v3651_v36 = vpack.c.bf16 %v3332_v33, %v634_v35 }
 0x1d5   : > { %3653 = vmatprep.subr.msk.bf16.mxu1 %vm4185_vm3, %v3651_v36  ;;  %v3335_v37 = vpop.f32.mrb[4].mxu1 }
 0x1d6   : > { %3656 = vmatpush3.bf16.xpose.msk.msra.mxu1 %vm4185_vm3, %v3651_v36  ;;  %v644_v38 = vpop.f32.mrb[5].mxu1 }
 0x1d7   : > { %v3657_v39 = vpack.c.bf16 %v3335_v37, %v644_v38 }
 0x1d9   : > { %3659 = vmatprep.subr.msk.bf16.mxu1 %vm4185_vm3, %v3657_v39  ;;  %v3338_v40 = vpop.f32.mrb[6].mxu1 }
 0x1da   : > { %v654_v41 = vpop.f32.mrb[7].mxu1 }
 0x1db   : > { %v3663_v42 = vpack.c.bf16 %v3338_v40, %v654_v41 }
 0x1dd   : > { %v3341_v43 = vpop.f32.mrb[8].mxu1 }
 0x1de   : > { %3662 = vmatpush3.bf16.xpose.msk.msra.mxu1 %vm4185_vm3, %v3657_v39  ;;  %v664_v44 = vpop.f32.mrb[9].mxu1 }
 0x1df   : > { %3665 = vmatprep.subr.msk.bf16.mxu1 %vm4185_vm3, %v3663_v42  ;;  %v3669_v45 = vpack.c.bf16 %v3341_v43, %v664_v44 }
 0x1e1   : > { %v3346_v46 = vpop.f32.mrb[10].mxu1 }
 0x1e2   : > { %v740_v47 = vpop.f32.mrb[11].mxu1 }
 0x1e3   : > { %v3675_v48 = vpack.c.bf16 %v3346_v46, %v740_v47  ;;  %v3002_v46 = vld [vmem:[%s4534_s6 + $0x8] sm:$0xff] }
 0x1e5   : > { %3676 = vmatprep.subr.bf16.mxu0 %v3675_v48  ;;  %v3349_v49 = vpop.f32.mrb[12].mxu1 }
 0x1e6   : > { %3668 = vmatpush3.bf16.xpose.msk.msra.mxu1 %vm4185_vm3, %v3663_v42  ;;  %3678 = vmatpush3.bf16.msra.mxu0 %v3675_v48  ;;  %v750_v50 = vpop.f32.mrb[13].mxu1 }
 0x1e7   : > { %3671 = vmatprep.subr.msk.bf16.mxu1 %vm4185_vm3, %v3669_v45  ;;  %v3679_v51 = vpack.c.bf16 %v3349_v49, %v750_v50 }
 0x1e9   : > { %v3352_v52 = vpop.f32.mrb[14].mxu1  ;;  %3680 = vmatprep.subr.bf16.mxu0 %v3679_v51 }
 0x1ea   : > { %v760_v53 = vpop.f32.mrb[15].mxu1  ;;  %3682 = vmatpush3.bf16.msra.mxu0 %v3679_v51 }
 0x1eb   : > { %v3683_v54 = vpack.c.bf16 %v3352_v52, %v760_v53 }
 0x1ed   : > { %v3355_v56 = vpop.f32.mrb[16].mxu1  ;;  %3684 = vmatprep.subr.bf16.mxu0 %v3683_v54 }
 0x1ee   : > { %3674 = vmatpush3.bf16.xpose.msk.msra.mxu1 %vm4185_vm3, %v3669_v45  ;;  %v770_v57 = vpop.f32.mrb[17].mxu1  ;;  %3686 = vmatpush3.bf16.msra.mxu0 %v3683_v54 }
 0x1ef   : > { %3401 = vmatprep.subr.mxu1 %v2990_v55  ;;  %v3687_v58 = vpack.c.bf16 %v3355_v56, %v770_v57 }
 0x1f1   : > { %3688 = vmatprep.subr.bf16.mxu0 %v3687_v58 }
 0x1f2   : > { %3690 = vmatpush3.bf16.msra.mxu0 %v3687_v58 }
 0x1f3   : > { %3692 = vmatprep.subr.bf16.mxu0 %v3691_v13 }
 0x1f5   : > { %3373 = vmatmul.mubr.msk.f32.vlgmr.msra.gmra.mrb[18].mxu1 %vm779_vm2, %v3327_v31 }
 0x1f6   : > { %3403 = vmatprep.mubr.msk.f32.mxu1 %vm461_vm1, %v4123_v20  ;;  %3402 = vmatpush3.msra.mxu1 %v2990_v55 }
 0x1f7   : > { %3420 = vmatprep.subr.mxu1 %v3002_v46 }
 0x1f9   : > { %3404 = vmatmul.mubr.msk.f32.vlgmr.msra.gmra.mrb[20].mxu1 %vm461_vm1, %v4125_v21 }
 0x1fa   : > { %3422 = vmatprep.mubr.msk.f32.mxu1 %vm461_vm1, %v4127_v22  ;;  %3421 = vmatpush3.msra.mxu1 %v3002_v46 }
 0x1fd   : > { %3423 = vmatmul.mubr.msk.f32.vlgmr.msra.gmra.mrb[22].mxu1 %vm461_vm1, %v4138_v24 }
 0x1fe   : > { %3425 = vmatprep.mubr.msk.f32.mxu1 %vm461_vm1, %v4140_v25 }
 0x201   : > { %3426 = vmatmul.mubr.msk.f32.gmra.mrb[24].mxu1 %vm461_vm1, %v4146_v26 }
 0x202   : > { %3428 = vmatprep.mubr.msk.f32.mxu1 %vm461_vm1, %v4148_v27 }
 0x205   : > { %3429 = vmatmul.mubr.msk.f32.gmra.mrb[26].mxu1 %vm461_vm1, %v4154_v28 }
 0x206   : > { %3431 = vmatprep.mubr.msk.f32.mxu1 %vm461_vm1, %v4156_v29 }
 0x209   : > { %3432 = vmatmul.mubr.msk.f32.gmra.mrb[28].mxu1 %vm461_vm1, %v4162_v30 }
 0x2c8   : > { %v3374_v59 = vpop.f32.mrb[18].mxu1 }
 0x2c9   : > { %v876_v60 = vpop.f32.mrb[19].mxu1  ;;  %v889_v0 = vsel %vm885_vm4, %v3374_v59, -inf }
 0x2ca   : > { %v886_v61 = vsel %vm885_vm4, %v876_v60, -inf }
 0x2cb   : > { %887 = vmax.xlane.f32.xlu0 %v886_v61 }
 0x2cc   : > { %v4216_v62 = vpop.f32.mrb[20].mxu1 }
 0x2cd   : > { %v1148_v63 = vpop.f32.mrb[21].mxu1 }
 0x2cf   : > { %890 = vmax.xlane.f32.xlu0 %v889_v0 }
 0x2d0   : > { %v3424_v51 = vpop.f32.mrb[22].mxu1 }
 0x2d1   : > { %v1332_v52 = vpop.f32.mrb[23].mxu1 }
 0x2d2   : > { %v3719_v53 = vpack.c.bf16 %v3424_v51, %v1332_v52 }
 0x2d4   : > { %v3427_v54 = vpop.f32.mrb[24].mxu1  ;;  %3720 = vmatprep.subr.bf16.mxu1 %v3719_v53 }
 0x2d5   : > { %v1342_v55 = vpop.f32.mrb[25].mxu1  ;;  %3722 = vmatpush3.bf16.msra.mxu1 %v3719_v53 }
 0x2d6   : > { %v3723_v56 = vpack.c.bf16 %v3427_v54, %v1342_v55  ;;  %v3066_v54 = vld [vmem:[%s4532_s4 + $0x18] sm:$0xff]  ;;  %v3040_v55 = vld [vmem:[%s4534_s6 + $0x10] sm:$0xff] }
 0x2d8   : > { %3724 = vmatprep.subr.bf16.mxu1 %v3723_v56 }
 0x2d9   : > { %3726 = vmatpush3.bf16.msra.mxu1 %v3723_v56 }
 0x358   : > { %v888_v1 = vpop.xlane.xlu0 %887 }
 0x359   : > { %v892_v2 = vsub.f32 %v876_v60, %v888_v1 }
 0x35b   : > { %v894_v3 = vmul.f32 1.442695, %v892_v2 }
 0x35c   : > { %v891_v4 = vpop.xlane.xlu0 %890 }
 0x35d   : > { %3876 = vpow2.f32 %v894_v3  ;;  %v893_v5 = vsub.f32 %v3374_v59, %v891_v4  ;;  %v3430_v3 = vpop.f32.mrb[26].mxu1 }
 0x35e   : > { %v1352_v4 = vpop.f32.mrb[27].mxu1 }
 0x35f   : > { %v896_v6 = vmul.f32 1.442695, %v893_v5  ;;  %v3727_v5 = vpack.c.bf16 %v3430_v3, %v1352_v4 }
 0x361   : > { %3878 = vpow2.f32 %v896_v6  ;;  %v3433_v6 = vpop.f32.mrb[28].mxu1  ;;  %3728 = vmatprep.subr.bf16.mxu1 %v3727_v5 }
 0x362   : > { %3730 = vmatpush3.bf16.msra.mxu1 %v3727_v5 }
 0x367   : > { %v3877_v7 = vpop.eup %3876 }
 0x368   : > { %v898_v8 = vsel %vm885_vm4, %v3877_v7, 0.0 }
 0x369   : > { %899 = vadd.xlane.f32.xlu1 %v898_v8 }
 0x36b   : > { %v3879_v9 = vpop.eup %3878 }
 0x36c   : > { %v901_v10 = vsel %vm885_vm4, %v3879_v9, 0.0 }
 0x36d   : > { %902 = vadd.xlane.f32.xlu1 %v901_v10  ;;  %v3024_v10 = vld [vmem:[%s4535_s7 + $0x18] sm:$0xff] }
 0x3f6   : > { %v900_v14 = vpop.xlane.xlu1 %899 }
 0x3f7   : > { %3880 = vrcp.f32 %v900_v14 }
 0x3fa   : > { %v903_v15 = vpop.xlane.xlu1 %902 }
 0x3fb   : > { %3882 = vrcp.f32 %v903_v15 }
 0x401   : > { %v3881_v16 = vpop.eup %3880 }
 0x402   : > { %v906_v17 = vmul.f32 %v3881_v16, %v3877_v7  ;;  %v1362_v7 = vpop.f32.mrb[29].mxu1 }
 0x403   : > { %v3731_v8 = vpack.c.bf16 %v3433_v6, %v1362_v7 }
 0x404   : > { %3391 = vmatprep.mubr.msk.f32.mxu0 %vm885_vm4, %v906_v17 }
 0x405   : > { %v3883_v18 = vpop.eup %3882  ;;  %3732 = vmatprep.subr.bf16.mxu1 %v3731_v8 }
 0x406   : > { %v907_v19 = vmul.f32 %v3883_v18, %v3879_v9  ;;  %3734 = vmatpush3.bf16.msra.mxu1 %v3731_v8  ;;  %v3023_v9 = vld [vmem:[%s4535_s7 + $0x10] sm:$0xff] }
 0x407   : > { %v3735_v11 = vpack.c.bf16 %v3024_v10, %v3023_v9 }
 0x408   : > { %3392 = vmatmul.mubr.msk.f32.vlgmr.msra.gmra.mrb[2].mxu0 %vm885_vm4, %v907_v19 }
 0x409   : > { %3694 = vmatpush3.bf16.msra.mxu0 %v3691_v13 }
 0x40a   : > { %3406 = vmatprep.subr.mxu0 %v2993_v23 }
 0x4db   : > { %v3393_v31 = vpop.f32.mrb[2].mxu0 }
 0x4dc   : > { %v980_v32 = vpop.f32.mrb[3].mxu0 }
 0x4dd   : > { %3398 = vmatprep.mubr.msk.f32.mxu0 %vm779_vm2, %v980_v32  ;;  %v2989_v32 = vld [vmem:[%s4536_s8] ss:$0 sm:$0xff] }
 0x4de   : > { %3399 = vmatmul.mubr.msk.f32.vlgmr.msra.gmra.mrb[4].mxu0 %vm779_vm2, %v3393_v31  ;;  %v3031_v31 = vld [vmem:[%s4533_s5 + $0x10] sm:$0xff] }
 0x4df   : > { %3407 = vmatpush3.msra.mxu0 %v2993_v23  ;;  %3408 = vmatprep.mubr.msk.f32.mxu0 %vm461_vm1, %v4127_v22  ;;  %v3028_v23 = vld [vmem:[%s4532_s4 + $0x10] sm:$0xff] }
 0x4e0   : > { %3479 = vmatprep.subr.mxu1 %v3028_v23 }
 0x4e2   : > { %3409 = vmatmul.mubr.msk.f32.vlgmr.msra.gmra.mrb[6].mxu0 %vm461_vm1, %v4138_v24 }
 0x4e3   : > { %3411 = vmatprep.mubr.msk.f32.mxu0 %vm461_vm1, %v4140_v25 }
 0x4e6   : > { %3412 = vmatmul.mubr.msk.f32.gmra.mrb[8].mxu0 %vm461_vm1, %v4146_v26 }
 0x4e7   : > { %3414 = vmatprep.mubr.msk.f32.mxu0 %vm461_vm1, %v4148_v27 }
 0x4ea   : > { %3415 = vmatmul.mubr.msk.f32.gmra.mrb[10].mxu0 %vm461_vm1, %v4154_v28 }
 0x4eb   : > { %3417 = vmatprep.mubr.msk.f32.mxu0 %vm461_vm1, %v4156_v29 }
 0x4ee   : > { %3418 = vmatmul.mubr.msk.f32.gmra.mrb[12].mxu0 %vm461_vm1, %v4162_v30 }
 0x4ef   : > { %3450 = vmatprep.mubr.msk.f32.mxu0 %vm779_vm2, %v1148_v63 }
 0x5b5   : > { %v3410_v33 = vpop.f32.mrb[6].mxu0 }
 0x5b6   : > { %v1225_v35 = vpop.f32.mrb[7].mxu0 }
 0x5b7   : > { %v3695_v36 = vpack.c.bf16 %v3410_v33, %v1225_v35 }
 0x5b9   : > { %3697 = vmatprep.subr.msk.bf16.mxu0 %vm4185_vm3, %v3695_v36  ;;  %v3413_v37 = vpop.f32.mrb[8].mxu0 }
 0x5ba   : > { %3700 = vmatpush3.bf16.xpose.msk.msra.mxu0 %vm4185_vm3, %v3695_v36  ;;  %v1235_v38 = vpop.f32.mrb[9].mxu0 }
 0x5bb   : > { %v3701_v39 = vpack.c.bf16 %v3413_v37, %v1235_v38 }
 0x5bd   : > { %3703 = vmatprep.subr.msk.bf16.mxu0 %vm4185_vm3, %v3701_v39  ;;  %v3416_v40 = vpop.f32.mrb[10].mxu0 }
 0x5be   : > { %v1245_v41 = vpop.f32.mrb[11].mxu0 }
 0x5bf   : > { %v3707_v42 = vpack.c.bf16 %v3416_v40, %v1245_v41 }
 0x5c1   : > { %v3419_v43 = vpop.f32.mrb[12].mxu0 }
 0x5c2   : > { %3706 = vmatpush3.bf16.xpose.msk.msra.mxu0 %vm4185_vm3, %v3701_v39  ;;  %v1255_v44 = vpop.f32.mrb[13].mxu0 }
 0x5c3   : > { %3709 = vmatprep.subr.msk.bf16.mxu0 %vm4185_vm3, %v3707_v42  ;;  %v3713_v45 = vpack.c.bf16 %v3419_v43, %v1255_v44 }
 0x5ca   : > { %3712 = vmatpush3.bf16.xpose.msk.msra.mxu0 %vm4185_vm3, %v3707_v42 }
 0x5cb   : > { %3715 = vmatprep.subr.msk.bf16.mxu0 %vm4185_vm3, %v3713_v45 }
 0x5d2   : > { %3718 = vmatpush3.bf16.xpose.msk.msra.mxu0 %vm4185_vm3, %v3713_v45 }
 0x5d3   : > { %3736 = vmatprep.subr.bf16.mxu0 %v3735_v11 }
 0x5d9   : > { %3451 = vmatmul.mubr.msk.f32.vlgmr.msra.gmra.mrb[14].mxu0 %vm779_vm2, %v4216_v62 }
 0x5da   : > { %3738 = vmatpush3.bf16.msra.mxu0 %v3735_v11 }
 0x5db   : > { %3498 = vmatprep.subr.mxu0 %v3040_v55 }
 0x6ac   : > { %v3452_v47 = vpop.f32.mrb[14].mxu0 }
 0x6ad   : > { %v1467_v48 = vpop.f32.mrb[15].mxu0  ;;  %v1479_v49 = vsel %vm885_vm4, %v3452_v47, -inf }
 0x6ae   : > { %1480 = vmax.xlane.f32.xlu1 %v1479_v49  ;;  %v1476_v50 = vsel %vm885_vm4, %v1467_v48, -inf }
 0x6af   : > { %1477 = vmax.xlane.f32.xlu0 %v1476_v50 }
 0x73b   : > { %v1481_v57 = vpop.xlane.xlu1 %1480 }
 0x73c   : > { %v1483_v58 = vsub.f32 %v3452_v47, %v1481_v57  ;;  %v1478_v59 = vpop.xlane.xlu0 %1477 }
 0x73d   : > { %v1482_v60 = vsub.f32 %v1467_v48, %v1478_v59 }
 0x73e   : > { %v1486_v61 = vmul.f32 1.442695, %v1483_v58 }
 0x73f   : > { %v1484_v62 = vmul.f32 1.442695, %v1482_v60 }
 0x740   : > { %3884 = vpow2.f32 %v1486_v61 }
 0x741   : > { %3886 = vpow2.f32 %v1484_v62 }
 0x74a   : > { %v3885_v63 = vpop.eup %3884 }
 0x74b   : > { %v3887_v0 = vpop.eup %3886  ;;  %v1491_v1 = vsel %vm885_vm4, %v3885_v63, 0.0 }
 0x74c   : > { %1492 = vadd.xlane.f32.xlu1 %v1491_v1  ;;  %v1488_v2 = vsel %vm885_vm4, %v3887_v0, 0.0 }
 0x74d   : > { %1489 = vadd.xlane.f32.xlu0 %v1488_v2 }
 0x7d9   : > { %v1493_v12 = vpop.xlane.xlu1 %1492 }
 0x7da   : > { %3888 = vrcp.f32 %v1493_v12  ;;  %v1490_v13 = vpop.xlane.xlu0 %1489 }
 0x7db   : > { %3890 = vrcp.f32 %v1490_v13 }
 0x7e4   : > { %v3889_v14 = vpop.eup %3888 }
 0x7e5   : > { %v3891_v15 = vpop.eup %3890  ;;  %v1497_v17 = vmul.f32 %v3889_v14, %v3885_v63 }
 0x7e6   : > { %v1496_v16 = vmul.f32 %v3891_v15, %v3887_v0 }
 0x7e8   : > { %3469 = vmatprep.mubr.msk.f32.mxu1 %vm885_vm4, %v1496_v16 }
 0x7e9   : > { %3470 = vmatmul.mubr.msk.f32.vlgmr.msra.gmra.mrb[30].mxu1 %vm885_vm4, %v1497_v17 }
 0x7ea   : > { %3480 = vmatpush3.msra.mxu1 %v3028_v23  ;;  %v3061_v23 = vld [vmem:[%s4535_s7 + $0x20] sm:$0xff] }
 0x7eb   : > { %3484 = vmatprep.subr.mxu1 %v3031_v31 }
 0x8bc   : > { %v3471_v18 = vpop.f32.mrb[30].mxu1 }
 0x8bd   : > { %v1570_v19 = vpop.f32.mrb[31].mxu1 }
 0x8be   : > { %3476 = vmatprep.mubr.msk.f32.mxu0 %vm779_vm2, %v1570_v19 }
 0x8bf   : > { %3477 = vmatmul.mubr.msk.f32.vlgmr.msra.gmra.mrb[4].mxu0 %vm779_vm2, %v3471_v18 }
 0x8c0   : > { %3500 = vmatprep.mubr.msk.f32.mxu0 %vm461_vm1, %v4127_v22  ;;  %3499 = vmatpush3.msra.mxu0 %v3040_v55 }
 0x8c3   : > { %3501 = vmatmul.mubr.msk.f32.vlgmr.msra.gmra.mrb[16].mxu0 %vm461_vm1, %v4138_v24 }
 0x8c4   : > { %3503 = vmatprep.mubr.msk.f32.mxu0 %vm461_vm1, %v4140_v25 }
 0x8c7   : > { %3504 = vmatmul.mubr.msk.f32.gmra.mrb[18].mxu0 %vm461_vm1, %v4146_v26 }
 0x8c8   : > { %3506 = vmatprep.mubr.msk.f32.mxu0 %vm461_vm1, %v4148_v27 }
 0x8cb   : > { %3507 = vmatmul.mubr.msk.f32.gmra.mrb[20].mxu0 %vm461_vm1, %v4154_v28 }
 0x8cc   : > { %3509 = vmatprep.mubr.msk.f32.mxu0 %vm461_vm1, %v4156_v29 }
 0x8cf   : > { %3510 = vmatmul.mubr.msk.f32.gmra.mrb[22].mxu0 %vm461_vm1, %v4162_v30 }
 0x992   : > { %v3478_v33 = vpop.f32.mrb[4].mxu0 }
 0x993   : > { %v3827_v35 = vadd.f32 %v3478_v33, %v2989_v32  ;;  %v1654_v36 = vpop.f32.mrb[5].mxu0 }
 0x994   : > { %v3828_v37 = vadd.f32 %v2989_v32, %v1654_v36 }
 0x995   : > { %v4315_v39 = vadd.f32 %v3827_v35, %v4125_v21 }
 0x996   : > { %v4312_v38 = vadd.f32 %v3828_v37, %v4123_v20  ;;  %v3502_v62 = vpop.f32.mrb[16].mxu0 }
 0x997   : > { %v1927_v63 = vpop.f32.mrb[17].mxu0 }
 0x998   : > { %3481 = vmatprep.mubr.msk.f32.mxu1 %vm461_vm1, %v4312_v38  ;;  %v3763_v0 = vpack.c.bf16 %v3502_v62, %v1927_v63 }
 0x999   : > { %3482 = vmatmul.mubr.msk.f32.vlgmr.msra.gmra.mrb[32].mxu1 %vm461_vm1, %v4315_v39 }
 0x99a   : > { %3485 = vmatpush3.msra.mxu1 %v3031_v31  ;;  %3486 = vmatprep.mubr.msk.f32.mxu1 %vm461_vm1, %v4127_v22  ;;  %v3505_v1 = vpop.f32.mrb[18].mxu0  ;;  %v3062_v31 = vld [vmem:[%s4535_s7 + $0x28] sm:$0xff] }
 0x99b   : > { %3764 = vmatprep.subr.bf16.mxu0 %v3763_v0  ;;  %v1937_v2 = vpop.f32.mrb[19].mxu0  ;;  %v3779_v32 = vpack.c.bf16 %v3062_v31, %v3061_v23 }
 0x99c   : > { %3766 = vmatpush3.bf16.msra.mxu0 %v3763_v0  ;;  %v3767_v3 = vpack.c.bf16 %v3505_v1, %v1937_v2 }
 0x99d   : > { %3487 = vmatmul.mubr.msk.f32.vlgmr.msra.gmra.mrb[34].mxu1 %vm461_vm1, %v4138_v24 }
 0x99e   : > { %3489 = vmatprep.mubr.msk.f32.mxu1 %vm461_vm1, %v4140_v25  ;;  %3768 = vmatprep.subr.bf16.mxu0 %v3767_v3  ;;  %v3508_v14 = vpop.f32.mrb[20].mxu0 }
 0x99f   : > { %v1947_v15 = vpop.f32.mrb[21].mxu0 }
 0x9a0   : > { %3770 = vmatpush3.bf16.msra.mxu0 %v3767_v3  ;;  %v3771_v16 = vpack.c.bf16 %v3508_v14, %v1947_v15 }
 0x9a1   : > { %3490 = vmatmul.mubr.msk.f32.gmra.mrb[36].mxu1 %vm461_vm1, %v4146_v26 }
 0x9a2   : > { %3492 = vmatprep.mubr.msk.f32.mxu1 %vm461_vm1, %v4148_v27  ;;  %v3511_v17 = vpop.f32.mrb[22].mxu0  ;;  %3772 = vmatprep.subr.bf16.mxu0 %v3771_v16 }
 0x9a3   : > { %v1957_v18 = vpop.f32.mrb[23].mxu0 }
 0x9a4   : > { %3774 = vmatpush3.bf16.msra.mxu0 %v3771_v16  ;;  %v3775_v19 = vpack.c.bf16 %v3511_v17, %v1957_v18 }
 0x9a5   : > { %3493 = vmatmul.mubr.msk.f32.gmra.mrb[38].mxu1 %vm461_vm1, %v4154_v28 }
 0x9a6   : > { %3495 = vmatprep.mubr.msk.f32.mxu1 %vm461_vm1, %v4156_v29  ;;  %3776 = vmatprep.subr.bf16.mxu0 %v3775_v19 }
 0x9a8   : > { %3778 = vmatpush3.bf16.msra.mxu0 %v3775_v19 }
 0x9a9   : > { %3496 = vmatmul.mubr.msk.f32.gmra.mrb[40].mxu1 %vm461_vm1, %v4162_v30  ;;  %3780 = vmatprep.subr.bf16.mxu0 %v3779_v32 }
 0xa6c   : > { %v3483_v40 = vpop.f32.mrb[32].mxu1 }
 0xa6d   : > { %v1743_v41 = vpop.f32.mrb[33].mxu1 }
 0xa6e   : > { %3528 = vmatprep.mubr.msk.f32.mxu1 %vm779_vm2, %v1743_v41 }
 0xa70   : > { %v3488_v42 = vpop.f32.mrb[34].mxu1 }
 0xa71   : > { %v1820_v43 = vpop.f32.mrb[35].mxu1 }
 0xa72   : > { %v3739_v44 = vpack.c.bf16 %v3488_v42, %v1820_v43  ;;  %v3069_v42 = vld [vmem:[%s4533_s5 + $0x18] sm:$0xff] }
 0xa74   : > { %3741 = vmatprep.subr.msk.bf16.mxu1 %vm4185_vm3, %v3739_v44  ;;  %v3491_v45 = vpop.f32.mrb[36].mxu1 }
 0xa75   : > { %3744 = vmatpush3.bf16.xpose.msk.msra.mxu1 %vm4185_vm3, %v3739_v44  ;;  %v1830_v46 = vpop.f32.mrb[37].mxu1 }
 0xa76   : > { %v3745_v47 = vpack.c.bf16 %v3491_v45, %v1830_v46 }
 0xa78   : > { %3747 = vmatprep.subr.msk.bf16.mxu1 %vm4185_vm3, %v3745_v47  ;;  %v3494_v48 = vpop.f32.mrb[38].mxu1 }
 0xa79   : > { %v1840_v49 = vpop.f32.mrb[39].mxu1 }
 0xa7a   : > { %v3751_v50 = vpack.c.bf16 %v3494_v48, %v1840_v49 }
 0xa7c   : > { %v3497_v51 = vpop.f32.mrb[40].mxu1 }
 0xa7d   : > { %3750 = vmatpush3.bf16.xpose.msk.msra.mxu1 %vm4185_vm3, %v3745_v47  ;;  %v1850_v52 = vpop.f32.mrb[41].mxu1 }
 0xa7e   : > { %3753 = vmatprep.subr.msk.bf16.mxu1 %vm4185_vm3, %v3751_v50  ;;  %v3757_v53 = vpack.c.bf16 %v3497_v51, %v1850_v52 }
 0xa85   : > { %3756 = vmatpush3.bf16.xpose.msk.msra.mxu1 %vm4185_vm3, %v3751_v50 }
 0xa86   : > { %3759 = vmatprep.subr.msk.bf16.mxu1 %vm4185_vm3, %v3757_v53 }
 0xa8d   : > { %3762 = vmatpush3.bf16.xpose.msk.msra.mxu1 %vm4185_vm3, %v3757_v53 }
 0xa8e   : > { %3557 = vmatprep.subr.mxu1 %v3066_v54 }
 0xa94   : > { %3529 = vmatmul.mubr.msk.f32.vlgmr.msra.gmra.mrb[42].mxu1 %vm779_vm2, %v3483_v40 }
 0xa95   : > { %3559 = vmatprep.mubr.msk.f32.mxu1 %vm461_vm1, %v4312_v38  ;;  %3558 = vmatpush3.msra.mxu1 %v3066_v54 }
 0xa98   : > { %3560 = vmatmul.mubr.msk.f32.vlgmr.msra.gmra.mrb[44].mxu1 %vm461_vm1, %v4315_v39 }
 0xa99   : > { %3578 = vmatprep.mubr.msk.f32.mxu1 %vm461_vm1, %v4127_v22 }
 0xb67   : > { %v3530_v56 = vpop.f32.mrb[42].mxu1 }
 0xb68   : > { %v2062_v57 = vpop.f32.mrb[43].mxu1  ;;  %v2074_v58 = vsel %vm885_vm4, %v3530_v56, -inf }
 0xb69   : > { %2075 = vmax.xlane.f32.xlu1 %v2074_v58  ;;  %v2071_v59 = vsel %vm885_vm4, %v2062_v57, -inf }
 0xb6a   : > { %2072 = vmax.xlane.f32.xlu0 %v2071_v59 }
 0xb6b   : > { %v4383_v60 = vpop.f32.mrb[44].mxu1 }
 0xb6c   : > { %v4385_v61 = vpop.f32.mrb[45].mxu1 }
 0xbf6   : > { %v2076_v4 = vpop.xlane.xlu1 %2075 }
 0xbf7   : > { %v2078_v5 = vsub.f32 %v3530_v56, %v2076_v4  ;;  %v2073_v6 = vpop.xlane.xlu0 %2072  ;;  %v3078_v56 = vld [vmem:[%s4534_s6 + $0x18] sm:$0xff] }
 0xbf8   : > { %v2077_v7 = vsub.f32 %v2062_v57, %v2073_v6  ;;  %3576 = vmatprep.subr.mxu1 %v3078_v56 }
 0xbf9   : > { %v2081_v8 = vmul.f32 1.442695, %v2078_v5  ;;  %3577 = vmatpush3.msra.mxu1 %v3078_v56 }
 0xbfa   : > { %v2079_v9 = vmul.f32 1.442695, %v2077_v7  ;;  %3579 = vmatmul.mubr.msk.f32.vlgmr.msra.gmra.mrb[46].mxu1 %vm461_vm1, %v4138_v24 }
 0xbfb   : > { %3892 = vpow2.f32 %v2081_v8  ;;  %3581 = vmatprep.mubr.msk.f32.mxu1 %vm461_vm1, %v4140_v25 }
 0xbfc   : > { %3894 = vpow2.f32 %v2079_v9 }
 0xbfe   : > { %3582 = vmatmul.mubr.msk.f32.gmra.mrb[48].mxu1 %vm461_vm1, %v4146_v26 }
 0xbff   : > { %3584 = vmatprep.mubr.msk.f32.mxu1 %vm461_vm1, %v4148_v27 }
 0xc02   : > { %3585 = vmatmul.mubr.msk.f32.gmra.mrb[50].mxu1 %vm461_vm1, %v4154_v28 }
 0xc03   : > { %3587 = vmatprep.mubr.msk.f32.mxu1 %vm461_vm1, %v4156_v29 }
 0xc05   : > { %v3893_v10 = vpop.eup %3892 }
 0xc06   : > { %v3895_v11 = vpop.eup %3894  ;;  %v2086_v12 = vsel %vm885_vm4, %v3893_v10, 0.0  ;;  %3588 = vmatmul.mubr.msk.f32.gmra.mrb[52].mxu1 %vm461_vm1, %v4162_v30 }
 0xc07   : > { %2087 = vadd.xlane.f32.xlu1 %v2086_v12  ;;  %v2083_v13 = vsel %vm885_vm4, %v3895_v11, 0.0  ;;  %v3100_v12 = vld [vmem:[%s4535_s7 + $0x38] sm:$0xff] }
 0xc08   : > { %2084 = vadd.xlane.f32.xlu0 %v2083_v13 }
 0xc94   : > { %v2088_v33 = vpop.xlane.xlu1 %2087 }
 0xc95   : > { %3896 = vrcp.f32 %v2088_v33  ;;  %v2085_v35 = vpop.xlane.xlu0 %2084 }
 0xc96   : > { %3898 = vrcp.f32 %v2085_v35 }
 0xc9f   : > { %v3897_v36 = vpop.eup %3896 }
 0xca0   : > { %v3899_v37 = vpop.eup %3898  ;;  %v2092_v41 = vmul.f32 %v3897_v36, %v3893_v10 }
 0xca1   : > { %v2091_v40 = vmul.f32 %v3899_v37, %v3895_v11  ;;  %v3099_v11 = vld [vmem:[%s4535_s7 + $0x30] sm:$0xff] }
 0xca2   : > { %v3823_v13 = vpack.c.bf16 %v3100_v12, %v3099_v11 }
 0xca3   : > { %3547 = vmatprep.mubr.msk.f32.mxu0 %vm885_vm4, %v2091_v40 }
 0xca4   : > { %3548 = vmatmul.mubr.msk.f32.vlgmr.msra.gmra.mrb[24].mxu0 %vm885_vm4, %v2092_v41 }
 0xca5   : > { %3782 = vmatpush3.bf16.msra.mxu0 %v3779_v32  ;;  %v3065_v32 = vld [vmem:[%s4536_s8 + $0x1] ss:$0 sm:$0xff] }
 0xca6   : > { %3562 = vmatprep.subr.mxu0 %v3069_v42 }
 0xd77   : > { %v3549_v43 = vpop.f32.mrb[24].mxu0 }
 0xd78   : > { %v2165_v44 = vpop.f32.mrb[25].mxu0 }
 0xd79   : > { %3554 = vmatprep.mubr.msk.f32.mxu0 %vm779_vm2, %v2165_v44 }
 0xd7a   : > { %3555 = vmatmul.mubr.msk.f32.vlgmr.msra.gmra.mrb[26].mxu0 %vm779_vm2, %v3549_v43 }
 0xd7b   : > { %3563 = vmatpush3.msra.mxu0 %v3069_v42  ;;  %3564 = vmatprep.mubr.msk.f32.mxu0 %vm461_vm1, %v4127_v22 }
 0xd7e   : > { %3565 = vmatmul.mubr.msk.f32.vlgmr.msra.gmra.mrb[28].mxu0 %vm461_vm1, %v4138_v24 }
 0xd7f   : > { %3567 = vmatprep.mubr.msk.f32.mxu0 %vm461_vm1, %v4140_v25 }
 0xd82   : > { %3568 = vmatmul.mubr.msk.f32.gmra.mrb[30].mxu0 %vm461_vm1, %v4146_v26  ;;  %v3580_v26 = vpop.f32.mrb[46].mxu1 }
 0xd83   : > { %3570 = vmatprep.mubr.msk.f32.mxu0 %vm461_vm1, %v4148_v27  ;;  %v2518_v58 = vpop.f32.mrb[47].mxu1 }
 0xd84   : > { %v3807_v27 = vpack.c.bf16 %v3580_v26, %v2518_v58  ;;  %v3583_v59 = vpop.f32.mrb[48].mxu1 }
 0xd86   : > { %3571 = vmatmul.mubr.msk.f32.gmra.mrb[32].mxu0 %vm461_vm1, %v4154_v28  ;;  %3808 = vmatprep.subr.bf16.mxu1 %v3807_v27  ;;  %v2528_v28 = vpop.f32.mrb[49].mxu1 }
 0xd87   : > { %3573 = vmatprep.mubr.msk.f32.mxu0 %vm461_vm1, %v4156_v29  ;;  %3810 = vmatpush3.bf16.msra.mxu1 %v3807_v27  ;;  %v3586_v5 = vpop.f32.mrb[50].mxu1 }
 0xd88   : > { %v2538_v6 = vpop.f32.mrb[51].mxu1 }
 0xd89   : > { %v3815_v7 = vpack.c.bf16 %v3586_v5, %v2538_v6  ;;  %v3589_v8 = vpop.f32.mrb[52].mxu1 }
 0xd8a   : > { %3574 = vmatmul.mubr.msk.f32.gmra.mrb[34].mxu0 %vm461_vm1, %v4162_v30  ;;  %v2548_v9 = vpop.f32.mrb[53].mxu1 }
 0xd8b   : > { %3606 = vmatprep.mubr.msk.f32.mxu0 %vm779_vm2, %v4385_v61  ;;  %v3819_v10 = vpack.c.bf16 %v3589_v8, %v2548_v9 }
 0xe51   : > { %v3566_v22 = vpop.f32.mrb[28].mxu0 }
 0xe52   : > { %v2411_v45 = vpop.f32.mrb[29].mxu0 }
 0xe53   : > { %v3783_v46 = vpack.c.bf16 %v3566_v22, %v2411_v45 }
 0xe55   : > { %3785 = vmatprep.subr.msk.bf16.mxu0 %vm4185_vm3, %v3783_v46  ;;  %v3569_v47 = vpop.f32.mrb[30].mxu0 }
 0xe56   : > { %3788 = vmatpush3.bf16.xpose.msk.msra.mxu0 %vm4185_vm3, %v3783_v46  ;;  %v2421_v48 = vpop.f32.mrb[31].mxu0 }
 0xe57   : > { %v3789_v49 = vpack.c.bf16 %v3569_v47, %v2421_v48 }
 0xe59   : > { %3791 = vmatprep.subr.msk.bf16.mxu0 %vm4185_vm3, %v3789_v49  ;;  %v3572_v50 = vpop.f32.mrb[32].mxu0 }
 0xe5a   : > { %v2431_v51 = vpop.f32.mrb[33].mxu0 }
 0xe5b   : > { %v3795_v52 = vpack.c.bf16 %v3572_v50, %v2431_v51 }
 0xe5d   : > { %v3575_v53 = vpop.f32.mrb[34].mxu0 }
 0xe5e   : > { %3794 = vmatpush3.bf16.xpose.msk.msra.mxu0 %vm4185_vm3, %v3789_v49  ;;  %v2441_v54 = vpop.f32.mrb[35].mxu0 }
 0xe5f   : > { %3797 = vmatprep.subr.msk.bf16.mxu0 %vm4185_vm3, %v3795_v52  ;;  %v3801_v55 = vpack.c.bf16 %v3575_v53, %v2441_v54 }
 0xe66   : > { %3800 = vmatpush3.bf16.xpose.msk.msra.mxu0 %vm4185_vm3, %v3795_v52 }
 0xe67   : > { %3803 = vmatprep.subr.msk.bf16.mxu0 %vm4185_vm3, %v3801_v55 }
 0xe6e   : > { %3806 = vmatpush3.bf16.xpose.msk.msra.mxu0 %vm4185_vm3, %v3801_v55 }
 0xe6f   : > { %3824 = vmatprep.subr.bf16.mxu0 %v3823_v13 }
 0xe75   : > { %3607 = vmatmul.mubr.msk.f32.vlgmr.msra.gmra.mrb[36].mxu0 %vm779_vm2, %v4383_v60  ;;  %v3811_v60 = vpack.c.bf16 %v3583_v59, %v2528_v28 }
 0xe76   : > { %3826 = vmatpush3.bf16.msra.mxu0 %v3823_v13 }
 0xe77   : > { %3812 = vmatprep.subr.bf16.mxu1 %v3811_v60 }
 0xe78   : > { %3814 = vmatpush3.bf16.msra.mxu1 %v3811_v60 }
 0xe79   : > { %3816 = vmatprep.subr.bf16.mxu1 %v3815_v7 }
 0xe7c   : > { %3818 = vmatpush3.bf16.msra.mxu1 %v3815_v7 }
 0xe7d   : > { %3820 = vmatprep.subr.bf16.mxu1 %v3819_v10 }
 0xe80   : > { %3822 = vmatpush3.bf16.msra.mxu1 %v3819_v10 }
 0xf48   : > { %v3608_v34 = vpop.f32.mrb[36].mxu0 }
 0xf49   : > { %v2653_v24 = vpop.f32.mrb[37].mxu0  ;;  %v2665_v57 = vsel %vm885_vm4, %v3608_v34, -inf }
 0xf4a   : > { %2666 = vmax.xlane.f32.xlu1 %v2665_v57  ;;  %v2662_v25 = vsel %vm885_vm4, %v2653_v24, -inf }
 0xf4b   : > { %2663 = vmax.xlane.f32.xlu0 %v2662_v25 }
 0xfd7   : > { %v2667_v29 = vpop.xlane.xlu1 %2666 }
 0xfd8   : > { %v2669_v30 = vsub.f32 %v3608_v34, %v2667_v29  ;;  %v2664_v61 = vpop.xlane.xlu0 %2663 }
 0xfd9   : > { %v2668_v62 = vsub.f32 %v2653_v24, %v2664_v61 }
 0xfda   : > { %v2672_v63 = vmul.f32 1.442695, %v2669_v30 }
 0xfdb   : > { %v2670_v0 = vmul.f32 1.442695, %v2668_v62 }
 0xfdc   : > { %3900 = vpow2.f32 %v2672_v63 }
 0xfdd   : > { %3902 = vpow2.f32 %v2670_v0 }
 0xfe6   : > { %v3901_v1 = vpop.eup %3900 }
 0xfe7   : > { %v3903_v2 = vpop.eup %3902  ;;  %v2677_v3 = vsel %vm885_vm4, %v3901_v1, 0.0 }
 0xfe8   : > { %2678 = vadd.xlane.f32.xlu1 %v2677_v3  ;;  %v2674_v4 = vsel %vm885_vm4, %v3903_v2, 0.0 }
 0xfe9   : > { %2675 = vadd.xlane.f32.xlu0 %v2674_v4 }
0x1075   : > { %v2679_v14 = vpop.xlane.xlu1 %2678 }
0x1076   : > { %3904 = vrcp.f32 %v2679_v14  ;;  %v2676_v15 = vpop.xlane.xlu0 %2675 }
0x1077   : > { %3906 = vrcp.f32 %v2676_v15 }
0x1080   : > { %v3905_v16 = vpop.eup %3904 }
0x1081   : > { %v3907_v17 = vpop.eup %3906  ;;  %v2683_v19 = vmul.f32 %v3905_v16, %v3901_v1 }
0x1082   : > { %v2682_v18 = vmul.f32 %v3907_v17, %v3903_v2 }
0x1084   : > { %3625 = vmatprep.mubr.msk.f32.mxu1 %vm885_vm4, %v2682_v18 }
0x1085   : > { %3626 = vmatmul.mubr.msk.f32.vlgmr.msra.gmra.mrb[54].mxu1 %vm885_vm4, %v2683_v19 }
0x1158   : > { %v3627_v23 = vpop.f32.mrb[54].mxu1 }
0x1159   : > { %v2756_v31 = vpop.f32.mrb[55].mxu1 }
0x115a   : > { %3632 = vmatprep.mubr.msk.f32.mxu0 %vm779_vm2, %v2756_v31 }
0x115b   : > { %3633 = vmatmul.mubr.msk.f32.vlgmr.msra.gmra.mrb[26].mxu0 %vm779_vm2, %v3627_v23 }
0x122e   : > { %v3634_v33 = vpop.f32.mrb[26].mxu0 }
0x122f   : > { %v3829_v35 = vadd.f32 %v3634_v33, %v3065_v32  ;;  %v2840_v36 = vpop.f32.mrb[27].mxu0 }
0x1230   : > { %v3830_v37 = vadd.f32 %v3065_v32, %v2840_v36 }
0x1231   : > { %v2852_v40 = vadd.f32 %v3829_v35, %v4315_v39 }
0x1232   : > { %v2851_v41 = vadd.f32 %v3830_v37, %v4312_v38 }
0x1233   : > { %v2854_v42 = vadd.f32 %v2852_v40, %v4125_v21 }
0x1234   : > { %v2853_v43 = vadd.f32 %v2851_v41, %v4123_v20 }
0x1235   : > { %2856 = vst.msk [vmem:[%s340_s27 + $0x8] sm:$0xff] %vm461_vm1, %v2854_v42 }
0x1236   : > { %2855 = vst.msk [vmem:[%s340_s27] sm:$0xff] %vm461_vm1, %v2853_v43 }
0x1237   : > { %3921 = shalt.err (!%p3918_p3)
}
0x1238   : > { %s3922_s17 = scalar_lea.hbm %s4480_s14, 256  ;;  %s3926_s27 = scalar_lea.hbm %s4537_s9, 512 }
0x1239   : > { %p3923_p4 = scmp.ne.s32.totalorder %s4480_s14, %s3922_s17  ;;  %p3927_p9 = scmp.lt.u32.totalorder %s4480_s14, %s4537_s9 }
0x123a   : > { %p3928_p10 = scmp.lt.u32.totalorder %s3926_s27, %s3922_s17  ;;  %p3930_p12 = scmp.lt.u32.totalorder %s3922_s17, %s4480_s14 }
0x123b   : > { %p3924_p7 = pnand %p3923_p4, %p4063_p5 }
0x123c   : > { %p3929_p11 = por %p3928_p10, %p3927_p9 }
0x123d   : > { %p3925_p8 = pneg %p3924_p7 }
0x123e   : > { %p3931_p13 = por %p3930_p12, %p3929_p11 }
0x1240   : > { %p3932_p0 = pnand %p3931_p13, %p3925_p8 }
0x1242   : > { %3935 = shalt.err (!%p3932_p0)
}
0x1243   : > { %s3973_s21 = smov 128   ;;  %s3974_s16 = smov 8  }
0x1244   : > { %3835 = dma.vmem_to_hbm [thread:$0]  (%p4063_p5), %s4482_s28, 256, %s4480_s14, %s4487_s13, %s3973_s21, %s3973_s21, %s3974_s16  }
0x1245 PF: > { %p3841_p1 = scmp.ge.s32.totalorder %s3970_s12, 2  ;;  %s2886_s22 = sand.u32 1, %s3958_s30  }
0x1246   : > { %s2887_s23 = scalar_lea.sflag [#allocation3], %s2886_s22 }
0x1247   : > { %p3838_p2 = pnand %p3841_p1, %p4067_p6 }
0x1249   : > { %3953 = dma.done.wait (!%p3838_p2), %s2887_s23, 256  }
0x124a   : > { %3955 = vsyncadd (!%p3838_p2), %s2887_s23, 4294967040  ;;  %p19_p3 = scmp.ge.s32.totalorder %s4050_s15, 4   ;;  %s4542_s30 = smov %s3962_s10 }
0x124b   : > { %s4543_s10 = smov %s3966_s11  ;;  %s4544_s11 = smov %s4061_s18 }
0x124c   : > { %s4545_s12 = smov %s4050_s15  ;;  %21 = sbr.rel (!%p19_p3) target bundleno = 3 (0x3), region = 107 }
0x1253   :  { %2892 = vsyncpa [#allocation3], 1 }
0x1254   :  { %2894 = vsyncpa [#allocation3 + $0x1], 1 }

</bundles_post_ra>
